<compile_context>
chip_gen: v7x
topology: tpu7x:2x2x1
jax: 0.10.0
libtpu: 0.0.40
codegen_flags: <defaults>
</compile_context>

<pallas_src>
import functools
import math

import jax
import jax.numpy as jnp
from jax.experimental import pallas as pl
from jax.experimental.pallas import tpu as pltpu


# ================================ Pallas kernel =====================================
def _encoder_kernel(xcol_ref, ax_ref, w1_ref, b1_ref, w2_ref, b2_ref, o_ref,
                    *, H, W):
    """Fused conv1+BN1+ReLU -> +axial -> conv2+BN2+ReLU for one batch element.

    xcol_ref : (1, H*W, 9*Cin)   im2col'd padded input (tap k = 3*dy + dx)
    ax_ref   : (1, H*W, Cout)    axial feature (NHWC, spatial flattened)
    w1_ref   : (9*Cin, Cout)     conv1 weight matrix (BN1 folded)
    b1_ref   : (1, Cout)         conv1 bias (BN1 folded)
    w2_ref   : (9, Cout, Cout)   conv2 taps (BN2 folded); tap k = 3*dy + dx
    b2_ref   : (1, Cout)         conv2 bias (BN2 folded)
    o_ref    : (1, H*W, Cout)    output tile
    """
    HW = H * W
    cout = o_ref.shape[2]

    # ---- conv1 (single MXU matmul) + folded BN1 + ReLU + axial residual ----------
    h1 = jnp.dot(xcol_ref[0], w1_ref[...], preferred_element_type=jnp.float32)
    h1 = jnp.maximum(h1 + b1_ref[...], 0.0) + ax_ref[0]            # (HW, Cout)

    # ---- build zero-padded conv2 input purely in-register -------------------------
    h1 = h1.reshape(H, W, cout)                                     # trivial split
    zrow = jnp.zeros((1, W, cout), jnp.float32)
    h1p = jnp.concatenate([zrow, h1, zrow], axis=0)                 # (H+2, W, C)
    zcol = jnp.zeros((H + 2, 1, cout), jnp.float32)
    h1l = jnp.concatenate([zcol, h1p[:, :W - 1, :]], axis=1)        # x-1 neighbors
    h1r = jnp.concatenate([h1p[:, 1:, :], zcol], axis=1)            # x+1 neighbors
    shifted = (h1l, h1p, h1r)                                       # dx = 0, 1, 2

    # ---- conv2 (3x3, pad 1) as 9 accumulated MXU matmuls --------------------------
    acc2 = jnp.zeros((HW, cout), jnp.float32)
    for k in range(9):
        dy, dx = k // 3, k % 3
        patch = shifted[dx][dy:dy + H, :, :].reshape(HW, cout)      # trivial merge
        acc2 = acc2 + jnp.dot(patch, w2_ref[k],
                              preferred_element_type=jnp.float32)
    o_ref[0] = jnp.maximum(acc2 + b2_ref[...], 0.0).astype(o_ref.dtype)


# ================================ wrapper / glue =====================================
def _fold_conv_bn(w, b, gamma, beta, mean, var, eps=1e-5):
    """Fold BatchNorm (running stats) into a 3x3 conv.

    w: (Cout, Cin, 3, 3) PyTorch OIHW layout.
    Returns (taps (9, Cin, Cout), bias (1, Cout)) with tap k = 3*dy + dx.
    """
    scale = gamma * jax.lax.rsqrt(var + eps)                         # (Cout,)
    w_f = w * scale[:, None, None, None]
    b_f = (b - mean) * scale + beta
    taps = jnp.transpose(w_f, (2, 3, 1, 0)).reshape(9, w.shape[1], w.shape[0])
    return taps, b_f.reshape(1, -1)


def encoder_forward(x, axial_feature, params):
    """x: (B, Cin, H, W); axial_feature: (B, Cout, H, W) -> (B, Cout, H, W)."""
    B, Cin, H, W = x.shape
    Cout = params['conv1_w'].shape[0]
    HW = H * W

    w1_taps, b1 = _fold_conv_bn(params['conv1_w'], params['conv1_b'],
                                params['bn1_g'], params['bn1_b'],
                                params['bn1_m'], params['bn1_v'])
    w2_taps, b2 = _fold_conv_bn(params['conv2_w'], params['conv2_b'],
                                params['bn2_g'], params['bn2_b'],
                                params['bn2_m'], params['bn2_v'])
    w1_mat = w1_taps.reshape(9 * Cin, Cout)

    # NHWC, wrapper-side padding + im2col for conv1 (tiny tensors; keeps channels
    # on lanes inside the kernel and turns conv1 into one K=9*Cin matmul).
    x_nhwc = jnp.transpose(x, (0, 2, 3, 1))
    xpad = jnp.pad(x_nhwc, ((0, 0), (1, 1), (1, 1), (0, 0)))
    xcol = jnp.concatenate(
        [xpad[:, dy:dy + H, dx:dx + W, :] for dy in range(3) for dx in range(3)],
        axis=-1).reshape(B, HW, 9 * Cin)
    ax = jnp.transpose(axial_feature, (0, 2, 3, 1)).reshape(B, HW, Cout)

    kernel = functools.partial(_encoder_kernel, H=H, W=W)
    out = pl.pallas_call(
        kernel,
        out_shape=jax.ShapeDtypeStruct((B, HW, Cout), jnp.float32),
        grid=(B,),
        in_specs=[
            pl.BlockSpec((1, HW, 9 * Cin), lambda b: (b, 0, 0)),
            pl.BlockSpec((1, HW, Cout), lambda b: (b, 0, 0)),
            pl.BlockSpec((9 * Cin, Cout), lambda b: (0, 0)),
            pl.BlockSpec((1, Cout), lambda b: (0, 0)),
            pl.BlockSpec((9, Cout, Cout), lambda b: (0, 0, 0)),
            pl.BlockSpec((1, Cout), lambda b: (0, 0)),
        ],
        out_specs=pl.BlockSpec((1, HW, Cout), lambda b: (b, 0, 0)),
        compiler_params=pltpu.CompilerParams(
            dimension_semantics=("parallel",)),
    )(xcol, ax, w1_mat, b1, w2_taps, b2)

    return jnp.transpose(out.reshape(B, H, W, Cout), (0, 3, 1, 2))


# ============================ pure-JAX reference =====================================
def encoder_reference(x, axial_feature, params, eps=1e-5):
    def conv_bn_relu(v, w, b, g, beta, m, var):
        y = jax.lax.conv_general_dilated(
            v, w, window_strides=(1, 1), padding=((1, 1), (1, 1)),
            dimension_numbers=('NCHW', 'OIHW', 'NCHW'),
            precision=jax.lax.Precision.HIGHEST)
        y = y + b[None, :, None, None]
        y = (y - m[None, :, None, None]) * jax.lax.rsqrt(var + eps)[None, :, None, None]
        y = y * g[None, :, None, None] + beta[None, :, None, None]
        return jnp.maximum(y, 0.0)

    h = conv_bn_relu(x, params['conv1_w'], params['conv1_b'], params['bn1_g'],
                     params['bn1_b'], params['bn1_m'], params['bn1_v'])
    h = h + axial_feature
    return conv_bn_relu(h, params['conv2_w'], params['conv2_b'], params['bn2_g'],
                        params['bn2_b'], params['bn2_m'], params['bn2_v'])


# ================================ parameter init =====================================
def init_params(key, in_ch, out_ch):
    ks = jax.random.split(key, 12)
    n = lambda k, shape, s: s * jax.random.normal(k, shape, jnp.float32)
    return dict(
        conv1_w=n(ks[0], (out_ch, in_ch, 3, 3), 1.0 / math.sqrt(9 * in_ch)),
        conv1_b=n(ks[1], (out_ch,), 0.05),
        bn1_g=1.0 + n(ks[2], (out_ch,), 0.1),
        bn1_b=n(ks[3], (out_ch,), 0.1),
        bn1_m=n(ks[4], (out_ch,), 0.1),
        bn1_v=jnp.abs(1.0 + n(ks[5], (out_ch,), 0.1)),
        conv2_w=n(ks[6], (out_ch, out_ch, 3, 3), 1.0 / math.sqrt(9 * out_ch)),
        conv2_b=n(ks[7], (out_ch,), 0.05),
        bn2_g=1.0 + n(ks[8], (out_ch,), 0.1),
        bn2_b=n(ks[9], (out_ch,), 0.1),
        bn2_m=n(ks[10], (out_ch,), 0.1),
        bn2_v=jnp.abs(1.0 + n(ks[11], (out_ch,), 0.1)),
    )


# ===================================== main ==========================================
if __name__ == "__main__":
    B, IN_CH, OUT_CH, H, W = 2, 4, 32, 16, 16
    key = jax.random.PRNGKey(0)
    kx, ka, kp = jax.random.split(key, 3)
    x = jax.random.normal(kx, (B, IN_CH, H, W), jnp.float32)
    axial = jax.random.normal(ka, (B, OUT_CH, H, W), jnp.float32)
    params = init_params(kp, IN_CH, OUT_CH)

    out = jax.block_until_ready(jax.jit(encoder_forward)(x, axial, params))
    assert out.shape == (B, OUT_CH, H, W), out.shape
    assert bool(jnp.all(jnp.isfinite(out)))

    # Correctness check against a pure-JAX reference (loose tolerance: MXU f32
    # matmul passes vs XLA HIGHEST-precision conv may differ slightly).
    ref = jax.block_until_ready(jax.jit(encoder_reference)(x, axial, params))
    err = float(jnp.max(jnp.abs(out - ref)))
    assert err < 3e-2, f"max abs error vs reference: {err}"

    print("KERNEL_OK")
</pallas_src>

<mosaic_0001>
module attributes {stable_mosaic.version = 11 : i64} {
  func.func @_encoder_kernel(%arg0: i32, %arg1: memref<1x256x36xf32, #tpu.memory_space<vmem>>, %arg2: memref<1x256x32xf32, #tpu.memory_space<vmem>>, %arg3: memref<36x32xf32, #tpu.memory_space<vmem>>, %arg4: memref<1x32xf32, #tpu.memory_space<vmem>>, %arg5: memref<9x32x32xf32, #tpu.memory_space<vmem>>, %arg6: memref<1x32xf32, #tpu.memory_space<vmem>>, %arg7: memref<1x256x32xf32, #tpu.memory_space<vmem>>) attributes {dimension_semantics = [#tpu.dimension_semantics<parallel>], iteration_bounds = array<i64: 2>, scalar_prefetch = 0 : i64, scratch_operands = 0 : i64, tpu.core_type = #tpu.core_type<tc>, window_params = [{transform_indices = @transform_0, window_bounds = array<i64: 1, 256, 36>}, {transform_indices = @transform_1, window_bounds = array<i64: 1, 256, 32>}, {pipeline_mode = #tpu.pipeline_mode<synchronous>, transform_indices = @transform_2, window_bounds = array<i64: 36, 32>}, {pipeline_mode = #tpu.pipeline_mode<synchronous>, transform_indices = @transform_3, window_bounds = array<i64: 1, 32>}, {pipeline_mode = #tpu.pipeline_mode<synchronous>, transform_indices = @transform_4, window_bounds = array<i64: 9, 32, 32>}, {pipeline_mode = #tpu.pipeline_mode<synchronous>, transform_indices = @transform_5, window_bounds = array<i64: 1, 32>}, {transform_indices = @transform_6, window_bounds = array<i64: 1, 256, 32>}]} {
    %c0 = arith.constant 0 : index
    %c0_0 = arith.constant 0 : index
    %c0_1 = arith.constant 0 : index
    %0 = vector.load %arg1[%c0, %c0_0, %c0_1] : memref<1x256x36xf32, #tpu.memory_space<vmem>>, vector<1x256x36xf32>
    %1 = vector.shape_cast %0 : vector<1x256x36xf32> to vector<256x36xf32>
    %c0_2 = arith.constant 0 : index
    %c0_3 = arith.constant 0 : index
    %2 = vector.load %arg3[%c0_2, %c0_3] : memref<36x32xf32, #tpu.memory_space<vmem>>, vector<36x32xf32>
    %cst = arith.constant dense<0.000000e+00> : vector<256x32xf32>
    %3 = tpu.matmul %1, %2, %cst {dimension_numbers = #tpu.dot_dimension_numbers<[1], [0], [0], [1], [0, 0, 1, 1], [], []>} : vector<256x36xf32>, vector<36x32xf32>, vector<256x32xf32> -> vector<256x32xf32>
    %c0_4 = arith.constant 0 : index
    %c0_5 = arith.constant 0 : index
    %4 = vector.load %arg4[%c0_4, %c0_5] : memref<1x32xf32, #tpu.memory_space<vmem>>, vector<1x32xf32>
    %5 = vector.broadcast %4 : vector<1x32xf32> to vector<256x32xf32>
    %6 = arith.addf %3, %5 : vector<256x32xf32>
    %cst_6 = arith.constant 0.000000e+00 : f32
    %7 = vector.broadcast %cst_6 : f32 to vector<256x32xf32>
    %8 = arith.maximumf %6, %7 : vector<256x32xf32>
    %c0_7 = arith.constant 0 : index
    %c0_8 = arith.constant 0 : index
    %c0_9 = arith.constant 0 : index
    %9 = vector.load %arg2[%c0_7, %c0_8, %c0_9] : memref<1x256x32xf32, #tpu.memory_space<vmem>>, vector<1x256x32xf32>
    %10 = vector.shape_cast %9 : vector<1x256x32xf32> to vector<256x32xf32>
    %11 = arith.addf %8, %10 : vector<256x32xf32>
    %12 = vector.shape_cast %11 : vector<256x32xf32> to vector<16x16x32xf32>
    %cst_10 = arith.constant 0.000000e+00 : f32
    %13 = vector.broadcast %cst_10 : f32 to vector<1x16x32xf32>
    %14 = tpu.concatenate %13, %12, %13 in 0 : vector<1x16x32xf32>, vector<16x16x32xf32>, vector<1x16x32xf32> -> vector<18x16x32xf32>
    %cst_11 = arith.constant 0.000000e+00 : f32
    %15 = vector.broadcast %cst_11 : f32 to vector<18x1x32xf32>
    %16 = vector.extract_strided_slice %14 {offsets = [0, 0, 0], sizes = [18, 15, 32], strides = [1, 1, 1]} : vector<18x16x32xf32> to vector<18x15x32xf32>
    %17 = tpu.concatenate %15, %16 in 1 : vector<18x1x32xf32>, vector<18x15x32xf32> -> vector<18x16x32xf32>
    %18 = vector.extract_strided_slice %14 {offsets = [0, 1, 0], sizes = [18, 15, 32], strides = [1, 1, 1]} : vector<18x16x32xf32> to vector<18x15x32xf32>
    %19 = tpu.concatenate %18, %15 in 1 : vector<18x15x32xf32>, vector<18x1x32xf32> -> vector<18x16x32xf32>
    %cst_12 = arith.constant 0.000000e+00 : f32
    %20 = vector.broadcast %cst_12 : f32 to vector<256x32xf32>
    %21 = vector.extract_strided_slice %17 {offsets = [0, 0, 0], sizes = [16, 16, 32], strides = [1, 1, 1]} : vector<18x16x32xf32> to vector<16x16x32xf32>
    %22 = vector.shape_cast %21 : vector<16x16x32xf32> to vector<256x32xf32>
    %c0_13 = arith.constant 0 : index
    %c0_14 = arith.constant 0 : index
    %c0_15 = arith.constant 0 : index
    %23 = vector.load %arg5[%c0_13, %c0_14, %c0_15] : memref<9x32x32xf32, #tpu.memory_space<vmem>>, vector<1x32x32xf32>
    %24 = vector.shape_cast %23 : vector<1x32x32xf32> to vector<32x32xf32>
    %cst_16 = arith.constant dense<0.000000e+00> : vector<256x32xf32>
    %25 = tpu.matmul %22, %24, %cst_16 {dimension_numbers = #tpu.dot_dimension_numbers<[1], [0], [0], [1], [0, 0, 1, 1], [], []>} : vector<256x32xf32>, vector<32x32xf32>, vector<256x32xf32> -> vector<256x32xf32>
    %26 = arith.addf %20, %25 : vector<256x32xf32>
    %27 = vector.extract_strided_slice %14 {offsets = [0, 0, 0], sizes = [16, 16, 32], strides = [1, 1, 1]} : vector<18x16x32xf32> to vector<16x16x32xf32>
    %28 = vector.shape_cast %27 : vector<16x16x32xf32> to vector<256x32xf32>
    %c1 = arith.constant 1 : index
    %c0_17 = arith.constant 0 : index
    %c0_18 = arith.constant 0 : index
    %29 = vector.load %arg5[%c1, %c0_17, %c0_18] : memref<9x32x32xf32, #tpu.memory_space<vmem>>, vector<1x32x32xf32>
    %30 = vector.shape_cast %29 : vector<1x32x32xf32> to vector<32x32xf32>
    %cst_19 = arith.constant dense<0.000000e+00> : vector<256x32xf32>
    %31 = tpu.matmul %28, %30, %cst_19 {dimension_numbers = #tpu.dot_dimension_numbers<[1], [0], [0], [1], [0, 0, 1, 1], [], []>} : vector<256x32xf32>, vector<32x32xf32>, vector<256x32xf32> -> vector<256x32xf32>
    %32 = arith.addf %26, %31 : vector<256x32xf32>
    %33 = vector.extract_strided_slice %19 {offsets = [0, 0, 0], sizes = [16, 16, 32], strides = [1, 1, 1]} : vector<18x16x32xf32> to vector<16x16x32xf32>
    %34 = vector.shape_cast %33 : vector<16x16x32xf32> to vector<256x32xf32>
    %c2 = arith.constant 2 : index
    %c0_20 = arith.constant 0 : index
    %c0_21 = arith.constant 0 : index
    %35 = vector.load %arg5[%c2, %c0_20, %c0_21] : memref<9x32x32xf32, #tpu.memory_space<vmem>>, vector<1x32x32xf32>
    %36 = vector.shape_cast %35 : vector<1x32x32xf32> to vector<32x32xf32>
    %cst_22 = arith.constant dense<0.000000e+00> : vector<256x32xf32>
    %37 = tpu.matmul %34, %36, %cst_22 {dimension_numbers = #tpu.dot_dimension_numbers<[1], [0], [0], [1], [0, 0, 1, 1], [], []>} : vector<256x32xf32>, vector<32x32xf32>, vector<256x32xf32> -> vector<256x32xf32>
    %38 = arith.addf %32, %37 : vector<256x32xf32>
    %39 = vector.extract_strided_slice %17 {offsets = [1, 0, 0], sizes = [16, 16, 32], strides = [1, 1, 1]} : vector<18x16x32xf32> to vector<16x16x32xf32>
    %40 = vector.shape_cast %39 : vector<16x16x32xf32> to vector<256x32xf32>
    %c3 = arith.constant 3 : index
    %c0_23 = arith.constant 0 : index
    %c0_24 = arith.constant 0 : index
    %41 = vector.load %arg5[%c3, %c0_23, %c0_24] : memref<9x32x32xf32, #tpu.memory_space<vmem>>, vector<1x32x32xf32>
    %42 = vector.shape_cast %41 : vector<1x32x32xf32> to vector<32x32xf32>
    %cst_25 = arith.constant dense<0.000000e+00> : vector<256x32xf32>
    %43 = tpu.matmul %40, %42, %cst_25 {dimension_numbers = #tpu.dot_dimension_numbers<[1], [0], [0], [1], [0, 0, 1, 1], [], []>} : vector<256x32xf32>, vector<32x32xf32>, vector<256x32xf32> -> vector<256x32xf32>
    %44 = arith.addf %38, %43 : vector<256x32xf32>
    %45 = vector.extract_strided_slice %14 {offsets = [1, 0, 0], sizes = [16, 16, 32], strides = [1, 1, 1]} : vector<18x16x32xf32> to vector<16x16x32xf32>
    %46 = vector.shape_cast %45 : vector<16x16x32xf32> to vector<256x32xf32>
    %c4 = arith.constant 4 : index
    %c0_26 = arith.constant 0 : index
    %c0_27 = arith.constant 0 : index
    %47 = vector.load %arg5[%c4, %c0_26, %c0_27] : memref<9x32x32xf32, #tpu.memory_space<vmem>>, vector<1x32x32xf32>
    %48 = vector.shape_cast %47 : vector<1x32x32xf32> to vector<32x32xf32>
    %cst_28 = arith.constant dense<0.000000e+00> : vector<256x32xf32>
    %49 = tpu.matmul %46, %48, %cst_28 {dimension_numbers = #tpu.dot_dimension_numbers<[1], [0], [0], [1], [0, 0, 1, 1], [], []>} : vector<256x32xf32>, vector<32x32xf32>, vector<256x32xf32> -> vector<256x32xf32>
    %50 = arith.addf %44, %49 : vector<256x32xf32>
    %51 = vector.extract_strided_slice %19 {offsets = [1, 0, 0], sizes = [16, 16, 32], strides = [1, 1, 1]} : vector<18x16x32xf32> to vector<16x16x32xf32>
    %52 = vector.shape_cast %51 : vector<16x16x32xf32> to vector<256x32xf32>
    %c5 = arith.constant 5 : index
    %c0_29 = arith.constant 0 : index
    %c0_30 = arith.constant 0 : index
    %53 = vector.load %arg5[%c5, %c0_29, %c0_30] : memref<9x32x32xf32, #tpu.memory_space<vmem>>, vector<1x32x32xf32>
    %54 = vector.shape_cast %53 : vector<1x32x32xf32> to vector<32x32xf32>
    %cst_31 = arith.constant dense<0.000000e+00> : vector<256x32xf32>
    %55 = tpu.matmul %52, %54, %cst_31 {dimension_numbers = #tpu.dot_dimension_numbers<[1], [0], [0], [1], [0, 0, 1, 1], [], []>} : vector<256x32xf32>, vector<32x32xf32>, vector<256x32xf32> -> vector<256x32xf32>
    %56 = arith.addf %50, %55 : vector<256x32xf32>
    %57 = vector.extract_strided_slice %17 {offsets = [2, 0, 0], sizes = [16, 16, 32], strides = [1, 1, 1]} : vector<18x16x32xf32> to vector<16x16x32xf32>
    %58 = vector.shape_cast %57 : vector<16x16x32xf32> to vector<256x32xf32>
    %c6 = arith.constant 6 : index
    %c0_32 = arith.constant 0 : index
    %c0_33 = arith.constant 0 : index
    %59 = vector.load %arg5[%c6, %c0_32, %c0_33] : memref<9x32x32xf32, #tpu.memory_space<vmem>>, vector<1x32x32xf32>
    %60 = vector.shape_cast %59 : vector<1x32x32xf32> to vector<32x32xf32>
    %cst_34 = arith.constant dense<0.000000e+00> : vector<256x32xf32>
    %61 = tpu.matmul %58, %60, %cst_34 {dimension_numbers = #tpu.dot_dimension_numbers<[1], [0], [0], [1], [0, 0, 1, 1], [], []>} : vector<256x32xf32>, vector<32x32xf32>, vector<256x32xf32> -> vector<256x32xf32>
    %62 = arith.addf %56, %61 : vector<256x32xf32>
    %63 = vector.extract_strided_slice %14 {offsets = [2, 0, 0], sizes = [16, 16, 32], strides = [1, 1, 1]} : vector<18x16x32xf32> to vector<16x16x32xf32>
    %64 = vector.shape_cast %63 : vector<16x16x32xf32> to vector<256x32xf32>
    %c7 = arith.constant 7 : index
    %c0_35 = arith.constant 0 : index
    %c0_36 = arith.constant 0 : index
    %65 = vector.load %arg5[%c7, %c0_35, %c0_36] : memref<9x32x32xf32, #tpu.memory_space<vmem>>, vector<1x32x32xf32>
    %66 = vector.shape_cast %65 : vector<1x32x32xf32> to vector<32x32xf32>
    %cst_37 = arith.constant dense<0.000000e+00> : vector<256x32xf32>
    %67 = tpu.matmul %64, %66, %cst_37 {dimension_numbers = #tpu.dot_dimension_numbers<[1], [0], [0], [1], [0, 0, 1, 1], [], []>} : vector<256x32xf32>, vector<32x32xf32>, vector<256x32xf32> -> vector<256x32xf32>
    %68 = arith.addf %62, %67 : vector<256x32xf32>
    %69 = vector.extract_strided_slice %19 {offsets = [2, 0, 0], sizes = [16, 16, 32], strides = [1, 1, 1]} : vector<18x16x32xf32> to vector<16x16x32xf32>
    %70 = vector.shape_cast %69 : vector<16x16x32xf32> to vector<256x32xf32>
    %c8 = arith.constant 8 : index
    %c0_38 = arith.constant 0 : index
    %c0_39 = arith.constant 0 : index
    %71 = vector.load %arg5[%c8, %c0_38, %c0_39] : memref<9x32x32xf32, #tpu.memory_space<vmem>>, vector<1x32x32xf32>
    %72 = vector.shape_cast %71 : vector<1x32x32xf32> to vector<32x32xf32>
    %cst_40 = arith.constant dense<0.000000e+00> : vector<256x32xf32>
    %73 = tpu.matmul %70, %72, %cst_40 {dimension_numbers = #tpu.dot_dimension_numbers<[1], [0], [0], [1], [0, 0, 1, 1], [], []>} : vector<256x32xf32>, vector<32x32xf32>, vector<256x32xf32> -> vector<256x32xf32>
    %74 = arith.addf %68, %73 : vector<256x32xf32>
    %c0_41 = arith.constant 0 : index
    %c0_42 = arith.constant 0 : index
    %75 = vector.load %arg6[%c0_41, %c0_42] : memref<1x32xf32, #tpu.memory_space<vmem>>, vector<1x32xf32>
    %76 = vector.broadcast %75 : vector<1x32xf32> to vector<256x32xf32>
    %77 = arith.addf %74, %76 : vector<256x32xf32>
    %cst_43 = arith.constant 0.000000e+00 : f32
    %78 = vector.broadcast %cst_43 : f32 to vector<256x32xf32>
    %79 = arith.maximumf %77, %78 : vector<256x32xf32>
    %c0_44 = arith.constant 0 : index
    %c0_45 = arith.constant 0 : index
    %c0_46 = arith.constant 0 : index
    %80 = vector.load %arg7[%c0_44, %c0_45, %c0_46] : memref<1x256x32xf32, #tpu.memory_space<vmem>>, vector<1x256x32xf32>
    %81 = vector.shape_cast %80 : vector<1x256x32xf32> to vector<256x32xf32>
    %82 = vector.shape_cast %79 : vector<256x32xf32> to vector<1x256x32xf32>
    tpu.vector_store %arg7[%c0_44, %c0_45, %c0_46], %82 {strides = array<i32>} : memref<1x256x32xf32, #tpu.memory_space<vmem>>, vector<1x256x32xf32>,
    return
  }
  func.func @transform_0(%arg0: i32) -> (i32, i32, i32) {
    %c0_i32 = arith.constant 0 : i32
    %c0_i32_0 = arith.constant 0 : i32
    %c0_i32_1 = arith.constant 0 : i32
    return %arg0, %c0_i32, %c0_i32_0 : i32, i32, i32
  }
  func.func @transform_1(%arg0: i32) -> (i32, i32, i32) {
    %c0_i32 = arith.constant 0 : i32
    %c0_i32_0 = arith.constant 0 : i32
    %c0_i32_1 = arith.constant 0 : i32
    return %arg0, %c0_i32, %c0_i32_0 : i32, i32, i32
  }
  func.func @transform_2(%arg0: i32) -> (i32, i32) {
    %c0_i32 = arith.constant 0 : i32
    %c0_i32_0 = arith.constant 0 : i32
    %c0_i32_1 = arith.constant 0 : i32
    return %c0_i32, %c0_i32_0 : i32, i32
  }
  func.func @transform_3(%arg0: i32) -> (i32, i32) {
    %c0_i32 = arith.constant 0 : i32
    %c0_i32_0 = arith.constant 0 : i32
    %c0_i32_1 = arith.constant 0 : i32
    return %c0_i32, %c0_i32_0 : i32, i32
  }
  func.func @transform_4(%arg0: i32) -> (i32, i32, i32) {
    %c0_i32 = arith.constant 0 : i32
    %c0_i32_0 = arith.constant 0 : i32
    %c0_i32_1 = arith.constant 0 : i32
    %c0_i32_2 = arith.constant 0 : i32
    return %c0_i32, %c0_i32_0, %c0_i32_1 : i32, i32, i32
  }
  func.func @transform_5(%arg0: i32) -> (i32, i32) {
    %c0_i32 = arith.constant 0 : i32
    %c0_i32_0 = arith.constant 0 : i32
    %c0_i32_1 = arith.constant 0 : i32
    return %c0_i32, %c0_i32_0 : i32, i32
  }
  func.func @transform_6(%arg0: i32) -> (i32, i32, i32) {
    %c0_i32 = arith.constant 0 : i32
    %c0_i32_0 = arith.constant 0 : i32
    %c0_i32_1 = arith.constant 0 : i32
    return %arg0, %c0_i32, %c0_i32_0 : i32, i32, i32
  }
}

</mosaic_0001>

<bundles_post_ra>
// kernel: encoder_forward.1
= control target key start
LH: loop header
LB: loop body
LE: loop exit
PB: predicated region body
PF: predicated region fallthrough
CT: control target
= control target key end

     0   :  { %11 = vsyncpa [#allocation3], 0  ;;  %s6919_s0 = inlined_call_operand.vmem [shape: f32[2,256,36], index: 0, kind: input, shape index: {}]   ;;  %s6920_s1 = inlined_call_operand.vmem [shape: f32[2,256,32], index: 1, kind: input, shape index: {}]   ;;  %s6921_s2 = inlined_call_operand.vmem [shape: f32[36,32], index: 2, kind: input, shape index: {}]   ;;  %s6922_s3 = inlined_call_operand.vmem [shape: f32[1,32], index: 3, kind: input, shape index: {}]   ;;  %s6923_s4 = inlined_call_operand.vmem [shape: f32[9,32,32], index: 4, kind: input, shape index: {}]   ;;  %s6924_s5 = inlined_call_operand.vmem [shape: f32[1,32], index: 5, kind: input, shape index: {}]   ;;  %s6925_s6 = inlined_call_operand.hbm [shape: f32[2,256,32], index: 6, kind: output, shape index: {}]  }
   0x1   :  { %13 = vsyncpa [#allocation3 + $0x1], 0  ;;  %s5432_s21 = smov 0   ;;  %s5434_s22 = smov 0  }
   0x2   :  { %s5436_s23 = smov 0   ;;  %s5438_s24 = smov 0  }
   0x3 LB: > { %s5453_s25 = sadd.s32 4294967295, %s5391_s24   ;;  %s3660_s26 = sadd.s32 4294967294, %s5391_s24   ;;  %s5391_s24 = sphi %s5438_s24, %s7079_s24   ;;  %s5387_s23 = sphi %s5436_s23, %s7078_s23   ;;  %s5383_s22 = sphi %s5434_s22, %s7077_s22   ;;  %s5379_s21 = sphi %s5432_s21, %s7076_s21  }
   0x4   : > { %s5457_s27 = sadd.s32 1, %s5391_s24   ;;  %s162_s28 = sadd.s32 1, %s5387_s23 }
   0x5   : > { %s159_s29 = ssub.s32 %s5391_s24, %s5457_s27  ;;  %p172_p0 = scmp.ne.s32.totalorder %s5387_s23, %s5383_s22 }
   0x6   : > { %p160_p1 = scmp.eq.s32.totalorder %s159_s29, 0  ;;  %p173_p2 = scmp.eq.s32.totalorder %s5453_s25, 1 }
   0x7   : > { %p178_p3 = scmp.ne.s32.totalorder %s5383_s22, %s5379_s21  ;;  %p179_p4 = scmp.eq.s32.totalorder %s3660_s26, 1 }
   0x8   : > { %s5468_s30 = scalar_select %p160_p1, %s5387_s23, %s162_s28  }
   0x9   : > { %p5470_p5 = por %p173_p2, %p172_p0  ;;  %p5474_p6 = por %p179_p4, %p178_p3 }
   0xa   : > { %p3663_p7 = scmp.ge.s32.totalorder %s5391_s24, 1  ;;  %p225_p8 = scmp.lt.s32.totalorder %s5391_s24, 3 }
   0xc   : > { %p226_p9 = pnand %p3663_p7, %p225_p8 }
   0xe   : > { %229 = sbr.rel (%p226_p9) target bundleno = 804 (0x324), region = 44 }
  0x15   : > { %v302_v0 = vld [vmem:[%s6921_s2] sm:$0xff]  ;;  %v303_v1 = vld [vmem:[%s6921_s2 + $0x8] sm:$0xff]  ;;  %v304_v2 = vld [vmem:[%s6921_s2 + $0x10] sm:$0xff]  ;;  %p260_p10 = scmp.lt.s32.totalorder %s5453_s25, 1  ;;  %vm314_vm0 = vcmask 293888   ;;  %vm411_vm1 = vcmask 1043456  }
  0x16   : > { %v4951_v3 = vpack.c.bf16 %v303_v1, %v302_v0  ;;  %v305_v4 = vld [vmem:[%s6921_s2 + $0x18] sm:$0xff]  ;;  %v306_v6 = vld [vmem:[%s6921_s2 + $0x20] sm:$0xf]  ;;  %v3704_v9 = vld [vmem:[%s6923_s4 + $0x28] sm:$0xff]  ;;  %v6926_v51 = vmov 0.0   ;;  %vm948_vm2 = vcmask 261120  }
  0x17   : > { %v4955_v5 = vpack.c.bf16 %v305_v4, %v304_v2  ;;  %s5494_s17 = scalar_select %p260_p10, %s5453_s25, 1  ;;  %v3703_v8 = vld [vmem:[%s6923_s4 + $0x20] sm:$0xff]  ;;  %v3842_v43 = vld [vmem:[%s6923_s4 + $0x88] sm:$0xff]  ;;  %v3705_v44 = vld [vmem:[%s6923_s4 + $0x30] sm:$0xff]  ;;  %vm769_vm3 = vcmask 1040384   ;;  %vm854_vm4 = vcmask 1046528  }
  0x18   : > { %4952 = vmatprep.subr.bf16.mxu0 %v4951_v3  ;;  %v4959_v10 = vpack.c.bf16 %v3704_v9, %v3703_v8  ;;  %v3841_v42 = vld [vmem:[%s6923_s4 + $0x80] sm:$0xff]  ;;  %v3706_v46 = vld [vmem:[%s6923_s4 + $0x38] sm:$0xff]  ;;  %v3843_v48 = vld [vmem:[%s6923_s4 + $0x90] sm:$0xff]  ;;  %s257_s15 = sand.u32 1, %s5383_s22   ;;  %s5394_s11 = smov [#allocation2]  }
  0x19   : > { %4954 = vmatpush3.bf16.msra.mxu0 %v4951_v3  ;;  %s4025_s18 = sshll.u32 %s5494_s17, 8  ;;  %v4991_v45 = vpack.c.bf16 %v3842_v43, %v3841_v42  ;;  %v4963_v47 = vpack.c.bf16 %v3706_v46, %v3705_v44  ;;  %v3844_v49 = vld [vmem:[%s6923_s4 + $0x98] sm:$0xff]  ;;  %v3877_v52 = vld [vmem:[%s6923_s4 + $0xa0] sm:$0xff]  ;;  %v3878_v53 = vld [vmem:[%s6923_s4 + $0xa8] sm:$0xff]  ;;  %s3664_s20 = sshll.u32 %s257_s15, 8 }
  0x1a   : > { %4956 = vmatprep.subr.bf16.mxu0 %v4955_v5  ;;  %s5505_s29 = scalar_lea.vmem %s6919_s0, %s4025_s18  ;;  %v4995_v50 = vpack.c.bf16 %v3844_v49, %v3843_v48  ;;  %v4999_v54 = vpack.c.bf16 %v3878_v53, %v3877_v52  ;;  %v939_v55 = vld [vmem:[%s6923_s4] sm:$0xff]  ;;  %v940_v56 = vld [vmem:[%s6923_s4 + $0x8] sm:$0xff]  ;;  %v941_v58 = vld [vmem:[%s6923_s4 + $0x10] sm:$0xff]  ;;  %s5634_s26 = scalar_lea.vmem %s6920_s1, %s4025_s18 }
  0x1b   : > { %v270_v7 = vld [vmem:[%s5505_s29] sm:$0xff]  ;;  %v271_v11 = vld [vmem:[%s5505_s29 + $0x8] sm:$0xff]  ;;  %v272_v12 = vld [vmem:[%s5505_s29 + $0x10] sm:$0xff]  ;;  %4992 = vmatprep.subr.bf16.mxu1 %v4991_v45  ;;  %v4967_v57 = vpack.c.bf16 %v940_v56, %v939_v55  ;;  %s4027_s17 = sshll.u32 %s5453_s25, 12  ;;  %s6878_s25 = scalar_lea.sflag [#allocation3], %s257_s15 }
  0x1c   : > { %4399 = vmatprep.mubr.msk.f32.mxu0 %vm314_vm0, %v270_v7  ;;  %v273_v13 = vld [vmem:[%s5505_s29 + $0x18] sm:$0xff]  ;;  %v274_v14 = vld [vmem:[%s5505_s29 + $0x20] sm:$0xff]  ;;  %v275_v15 = vld [vmem:[%s5505_s29 + $0x28] sm:$0xff]  ;;  %4994 = vmatpush3.bf16.msra.mxu1 %v4991_v45  ;;  %s6868_s9 = scalar_lea.hbm %s6925_s6, %s4027_s17  ;;  %s5333_s12 = sshll.u32 %s5394_s11, 4  ;;  %s5334_s12 = int_to_ptr.vmem [resolvable:$false] %s5333_s12 }
  0x1d   : > { %4958 = vmatpush3.bf16.msra.mxu0 %v4955_v5  ;;  %v276_v16 = vld [vmem:[%s5505_s29 + $0x30] sm:$0xff]  ;;  %v277_v17 = vld [vmem:[%s5505_s29 + $0x38] sm:$0xff]  ;;  %v278_v18 = vld [vmem:[%s5505_s29 + $0x40] sm:$0xff]  ;;  %4996 = vmatprep.subr.bf16.mxu1 %v4995_v50  ;;  %s5335_s13 = scalar_lea.vmem %s5334_s12, 8192 }
  0x1e   : > { %4397 = vmatprep.subr.msk.mxu0 %vm411_vm1, %v306_v6  ;;  %v279_v19 = vld [vmem:[%s5505_s29 + $0x48] sm:$0xff]  ;;  %v280_v20 = vld [vmem:[%s5505_s29 + $0x50] sm:$0xff]  ;;  %v281_v21 = vld [vmem:[%s5505_s29 + $0x58] sm:$0xff] }
  0x1f   : > { %v282_v22 = vld [vmem:[%s5505_s29 + $0x60] sm:$0xff]  ;;  %v283_v23 = vld [vmem:[%s5505_s29 + $0x68] sm:$0xff]  ;;  %v284_v24 = vld [vmem:[%s5505_s29 + $0x70] sm:$0xff] }
  0x20   : > { %v285_v25 = vld [vmem:[%s5505_s29 + $0x78] sm:$0xff]  ;;  %v286_v26 = vld [vmem:[%s5505_s29 + $0x80] sm:$0xff]  ;;  %v287_v27 = vld [vmem:[%s5505_s29 + $0x88] sm:$0xff]  ;;  %4998 = vmatpush3.bf16.msra.mxu1 %v4995_v50 }
  0x21   : > { %4398 = vmatpush3.msk.msra.mxu0 %vm411_vm1, %v306_v6  ;;  %v288_v28 = vld [vmem:[%s5505_s29 + $0x90] sm:$0xff]  ;;  %v289_v29 = vld [vmem:[%s5505_s29 + $0x98] sm:$0xff]  ;;  %v290_v30 = vld [vmem:[%s5505_s29 + $0xa0] sm:$0xff]  ;;  %5000 = vmatprep.subr.bf16.mxu1 %v4999_v54 }
  0x22   : > { %4400 = vmatmul.mubr.msk.f32.vlgmr.msra.gmra.mrb[0].mxu0 %vm314_vm0, %v271_v11  ;;  %4960 = vmatprep.subr.bf16.mxu0 %v4959_v10  ;;  %v291_v31 = vld [vmem:[%s5505_s29 + $0xa8] sm:$0xff]  ;;  %v292_v32 = vld [vmem:[%s5505_s29 + $0xb0] sm:$0xff]  ;;  %v293_v33 = vld [vmem:[%s5505_s29 + $0xb8] sm:$0xff] }
  0x23   : > { %4402 = vmatprep.mubr.msk.f32.mxu0 %vm314_vm0, %v272_v12  ;;  %4962 = vmatpush3.bf16.msra.mxu0 %v4959_v10  ;;  %v294_v34 = vld [vmem:[%s5505_s29 + $0xc0] sm:$0xff]  ;;  %v295_v35 = vld [vmem:[%s5505_s29 + $0xc8] sm:$0xff]  ;;  %v296_v36 = vld [vmem:[%s5505_s29 + $0xd0] sm:$0xff] }
  0x24   : > { %v297_v37 = vld [vmem:[%s5505_s29 + $0xd8] sm:$0xff]  ;;  %v298_v38 = vld [vmem:[%s5505_s29 + $0xe0] sm:$0xff]  ;;  %v299_v39 = vld [vmem:[%s5505_s29 + $0xe8] sm:$0xff]  ;;  %4964 = vmatprep.subr.bf16.mxu0 %v4963_v47 }
  0x25   : > { %v300_v40 = vld [vmem:[%s5505_s29 + $0xf0] sm:$0xff]  ;;  %v301_v41 = vld [vmem:[%s5505_s29 + $0xf8] sm:$0xff]  ;;  %v3769_v61 = vld [vmem:[%s6923_s4 + $0x40] sm:$0xff] }
  0x26   : > { %4403 = vmatmul.mubr.msk.f32.gmra.mrb[2].mxu0 %vm314_vm0, %v273_v13  ;;  %v942_v59 = vld [vmem:[%s6923_s4 + $0x18] sm:$0xff]  ;;  %v3770_v62 = vld [vmem:[%s6923_s4 + $0x48] sm:$0xff]  ;;  %v5626_v0 = vld [vmem:[%s6922_s3] ss:$0 sm:$0xff] }
  0x27   : > { %4405 = vmatprep.mubr.msk.f32.mxu0 %vm314_vm0, %v274_v14  ;;  %4966 = vmatpush3.bf16.msra.mxu0 %v4963_v47  ;;  %v4971_v60 = vpack.c.bf16 %v942_v59, %v941_v58  ;;  %v5621_v63 = vpack.c.bf16 %v3770_v62, %v3769_v61  ;;  %v673_v4 = vld [vmem:[%s5634_s26 + $0x8] sm:$0xff]  ;;  %v672_v7 = vld [vmem:[%s5634_s26] sm:$0xff]  ;;  %v3879_v10 = vld [vmem:[%s6923_s4 + $0xb0] sm:$0xff] }
  0x28   : > { %4968 = vmatprep.subr.bf16.mxu0 %v4967_v57  ;;  %v3880_v11 = vld [vmem:[%s6923_s4 + $0xb8] sm:$0xff]  ;;  %v678_v49 = vld [vmem:[%s5634_s26 + $0x30] sm:$0xff] }
  0x29   : > { %v679_v46 = vld [vmem:[%s5634_s26 + $0x38] sm:$0xff] }
  0x2a   : > { %4406 = vmatmul.mubr.msk.f32.gmra.mrb[4].mxu0 %vm314_vm0, %v275_v15 }
  0x2b   : > { %4408 = vmatprep.mubr.msk.f32.mxu0 %vm314_vm0, %v276_v16  ;;  %v675_v16 = vld [vmem:[%s5634_s26 + $0x18] sm:$0xff] }
  0x2e   : > { %4409 = vmatmul.mubr.msk.f32.gmra.mrb[6].mxu0 %vm314_vm0, %v277_v17 }
  0x2f   : > { %4411 = vmatprep.mubr.msk.f32.mxu0 %vm314_vm0, %v278_v18 }
  0x32   : > { %4412 = vmatmul.mubr.msk.f32.gmra.mrb[8].mxu0 %vm314_vm0, %v279_v19  ;;  %v674_v19 = vld [vmem:[%s5634_s26 + $0x10] sm:$0xff] }
  0x33   : > { %4414 = vmatprep.mubr.msk.f32.mxu0 %vm314_vm0, %v280_v20  ;;  %v5003_v20 = vpack.c.bf16 %v3880_v11, %v3879_v10 }
  0x36   : > { %4415 = vmatmul.mubr.msk.f32.gmra.mrb[10].mxu0 %vm314_vm0, %v281_v21 }
  0x37   : > { %4417 = vmatprep.mubr.msk.f32.mxu0 %vm314_vm0, %v282_v22 }
  0x3a   : > { %4418 = vmatmul.mubr.msk.f32.gmra.mrb[12].mxu0 %vm314_vm0, %v283_v23 }
  0x3b   : > { %4420 = vmatprep.mubr.msk.f32.mxu0 %vm314_vm0, %v284_v24 }
  0x3e   : > { %4421 = vmatmul.mubr.msk.f32.gmra.mrb[14].mxu0 %vm314_vm0, %v285_v25 }
  0x3f   : > { %4423 = vmatprep.mubr.msk.f32.mxu0 %vm314_vm0, %v286_v26 }
  0x42   : > { %4424 = vmatmul.mubr.msk.f32.gmra.mrb[16].mxu0 %vm314_vm0, %v287_v27  ;;  %v3913_v27 = vld [vmem:[%s6923_s4 + $0xc0] sm:$0xff] }
  0x43   : > { %4426 = vmatprep.mubr.msk.f32.mxu0 %vm314_vm0, %v288_v28  ;;  %v3914_v28 = vld [vmem:[%s6923_s4 + $0xc8] sm:$0xff] }
  0x46   : > { %4427 = vmatmul.mubr.msk.f32.gmra.mrb[18].mxu0 %vm314_vm0, %v289_v29 }
  0x47   : > { %4429 = vmatprep.mubr.msk.f32.mxu0 %vm314_vm0, %v290_v30 }
  0x4a   : > { %4430 = vmatmul.mubr.msk.f32.gmra.mrb[20].mxu0 %vm314_vm0, %v291_v31 }
  0x4b   : > { %4432 = vmatprep.mubr.msk.f32.mxu0 %vm314_vm0, %v292_v32 }
  0x4e   : > { %4433 = vmatmul.mubr.msk.f32.gmra.mrb[22].mxu0 %vm314_vm0, %v293_v33  ;;  %v677_v33 = vld [vmem:[%s5634_s26 + $0x28] sm:$0xff] }
  0x4f   : > { %4435 = vmatprep.mubr.msk.f32.mxu0 %vm314_vm0, %v294_v34 }
  0x52   : > { %4436 = vmatmul.mubr.msk.f32.gmra.mrb[24].mxu0 %vm314_vm0, %v295_v35 }
  0x53   : > { %4438 = vmatprep.mubr.msk.f32.mxu0 %vm314_vm0, %v296_v36 }
  0x56   : > { %4439 = vmatmul.mubr.msk.f32.gmra.mrb[26].mxu0 %vm314_vm0, %v297_v37  ;;  %v676_v37 = vld [vmem:[%s5634_s26 + $0x20] sm:$0xff] }
  0x57   : > { %4441 = vmatprep.mubr.msk.f32.mxu0 %vm314_vm0, %v298_v38  ;;  %v5685_v38 = vpack.c.bf16 %v3914_v28, %v3913_v27 }
  0x5a   : > { %4442 = vmatmul.mubr.msk.f32.gmra.mrb[28].mxu0 %vm314_vm0, %v299_v39 }
  0x5b   : > { %4444 = vmatprep.mubr.msk.f32.mxu0 %vm314_vm0, %v300_v40 }
  0x5e   : > { %4445 = vmatmul.mubr.msk.f32.gmra.mrb[30].mxu0 %vm314_vm0, %v301_v41 }
  0x5f   : > { %4455 = vmatprep.mubr.f32.mxu0 %v6926_v51 }
  0x62   : > { %4456 = vmatmul.mubr.f32.vlgmr.msra.gmra.mrb[32].mxu0 %v6926_v51 }
  0x63   : > { %4970 = vmatpush3.bf16.msra.mxu0 %v4967_v57  ;;  %v681_v57 = vld [vmem:[%s5634_s26 + $0x48] sm:$0xff] }
  0x64   : > { %4972 = vmatprep.subr.bf16.mxu0 %v4971_v60 }
  0x67   : > { %4974 = vmatpush3.bf16.msra.mxu0 %v4971_v60  ;;  %v680_v60 = vld [vmem:[%s5634_s26 + $0x40] sm:$0xff] }
  0x68   : > { %4976 = vmatprep.subr.bf16.mxu0 %v5621_v63 }
  0xf5   : > { %v4401_v1 = vpop.f32.mrb[0].mxu0 }
  0xf6   : > { %v487_v2 = vadd.f32 %v4401_v1, %v5626_v0  ;;  %v481_v3 = vpop.f32.mrb[1].mxu0 }
  0xf7   : > { %v482_v5 = vadd.f32 %v5626_v0, %v481_v3 }
  0xf8   : > { %v641_v6 = vmax.f32 %v487_v2, 0.0 }
  0xf9   : > { %v640_v8 = vmax.f32 %v482_v5, 0.0  ;;  %v4404_v9 = vpop.f32.mrb[2].mxu0  ;;  %v683_v5 = vld [vmem:[%s5634_s26 + $0x58] sm:$0xff] }
  0xfa   : > { %v5646_v12 = vadd.f32 %v673_v4, %v641_v6  ;;  %v497_v13 = vadd.f32 %v4404_v9, %v5626_v0  ;;  %v491_v14 = vpop.f32.mrb[3].mxu0 }
  0xfb   : > { %v5649_v15 = vadd.f32 %v672_v7, %v640_v8  ;;  %v492_v17 = vadd.f32 %v5626_v0, %v491_v14  ;;  %v682_v8 = vld [vmem:[%s5634_s26 + $0x50] sm:$0xff] }
  0xfc   : > { %v643_v18 = vmax.f32 %v497_v13, 0.0  ;;  %v858_v21 = vrot.slane %v5646_v12, 1  ;;  %v773_v22 = vrot.slane %v5646_v12, 7 }
  0xfd   : > { %v642_v23 = vmax.f32 %v492_v17, 0.0  ;;  %v4407_v24 = vpop.f32.mrb[4].mxu0  ;;  %4458 = vmatprep.mubr.msk.f32.mxu0 %vm948_vm2, %v5649_v15  ;;  %4679 = vmatprep.mubr.msk.f32.mxu1 %vm948_vm2, %v5649_v15  ;;  %v772_v25 = vrot.slane %v5649_v15, 7  ;;  %v857_v26 = vrot.slane %v5649_v15, 1  ;;  %v685_v17 = vld [vmem:[%s5634_s26 + $0x68] sm:$0xff]  ;;  %v3949_v15 = vld [vmem:[%s6923_s4 + $0xe0] sm:$0xff] }
  0xfe   : > { %v5668_v29 = vadd.f32 %v675_v16, %v643_v18  ;;  %v507_v30 = vadd.f32 %v4407_v24, %v5626_v0  ;;  %v501_v31 = vpop.f32.mrb[5].mxu0  ;;  %4459 = vmatmul.mubr.msk.f32.gmra.mrb[34].mxu0 %vm948_vm2, %v5646_v12  ;;  %4680 = vmatmul.mubr.msk.f32.vlgmr.msra.gmra.mrb[0].mxu1 %vm948_vm2, %v5646_v12 }
  0xff   : > { %v5675_v32 = vadd.f32 %v674_v19, %v642_v23  ;;  %v502_v34 = vadd.f32 %v5626_v0, %v501_v31  ;;  %5002 = vmatpush3.bf16.msra.mxu1 %v4999_v54  ;;  %v5682_v35 = vsel %vm854_vm4, %v857_v26, %v858_v21  ;;  %v5690_v39 = vsel %vm769_vm3, %v772_v25, %v773_v22 }
 0x100   : > { %6982 = vst [vmem:[#allocation5_spill] sm:$0xff] %v5668_v29  ;;  %v645_v36 = vmax.f32 %v507_v30, 0.0  ;;  %5004 = vmatprep.subr.bf16.mxu1 %v5003_v20  ;;  %6984 = vst [vmem:[#allocation7_spill] sm:$0xff] %v5690_v39  ;;  %v687_v30 = vld [vmem:[%s5634_s26 + $0x78] sm:$0xff] }
 0x101   : > { %6983 = vst [vmem:[#allocation6_spill] sm:$0xff] %v5675_v32  ;;  %v644_v40 = vmax.f32 %v502_v34, 0.0  ;;  %v4410_v41 = vpop.f32.mrb[6].mxu0  ;;  %4461 = vmatprep.mubr.msk.f32.mxu0 %vm948_vm2, %v5675_v32  ;;  %4682 = vmatprep.mubr.msk.f32.mxu1 %vm948_vm2, %v5675_v32  ;;  %v686_v34 = vld [vmem:[%s5634_s26 + $0x70] sm:$0xff] }
 0x102   : > { %v5696_v42 = vadd.f32 %v677_v33, %v645_v36  ;;  %v517_v43 = vadd.f32 %v4410_v41, %v5626_v0  ;;  %v511_v44 = vpop.f32.mrb[7].mxu0  ;;  %4462 = vmatmul.mubr.msk.f32.gmra.mrb[36].mxu0 %vm948_vm2, %v5668_v29  ;;  %4683 = vmatmul.mubr.msk.f32.gmra.mrb[2].mxu1 %vm948_vm2, %v5668_v29 }
 0x103   : > { %v5703_v45 = vadd.f32 %v676_v37, %v644_v40  ;;  %v512_v47 = vadd.f32 %v5626_v0, %v511_v44  ;;  %5006 = vmatpush3.bf16.msra.mxu1 %v5003_v20  ;;  %v684_v20 = vld [vmem:[%s5634_s26 + $0x60] sm:$0xff] }
 0x104   : > { %6985 = vst [vmem:[#allocation8_spill] sm:$0xff] %v5696_v42  ;;  %v647_v48 = vmax.f32 %v517_v43, 0.0  ;;  %5008 = vmatprep.subr.bf16.mxu1 %v5685_v38 }
 0x105   : > { %6986 = vst [vmem:[#allocation9_spill] sm:$0xff] %v5703_v45  ;;  %v646_v50 = vmax.f32 %v512_v47, 0.0  ;;  %v4413_v52 = vpop.f32.mrb[8].mxu0  ;;  %4464 = vmatprep.mubr.msk.f32.mxu0 %vm948_vm2, %v5703_v45  ;;  %4685 = vmatprep.mubr.msk.f32.mxu1 %vm948_vm2, %v5703_v45 }
 0x106   : > { %v5713_v53 = vadd.f32 %v679_v46, %v647_v48  ;;  %v527_v54 = vadd.f32 %v4413_v52, %v5626_v0  ;;  %v521_v55 = vpop.f32.mrb[9].mxu0  ;;  %4465 = vmatmul.mubr.msk.f32.gmra.mrb[38].mxu0 %vm948_vm2, %v5696_v42  ;;  %4686 = vmatmul.mubr.msk.f32.gmra.mrb[4].mxu1 %vm948_vm2, %v5696_v42  ;;  %v689_v46 = vld [vmem:[%s5634_s26 + $0x88] sm:$0xff] }
 0x107   : > { %v5720_v56 = vadd.f32 %v678_v49, %v646_v50  ;;  %v522_v58 = vadd.f32 %v5626_v0, %v521_v55  ;;  %v688_v49 = vld [vmem:[%s5634_s26 + $0x80] sm:$0xff] }
 0x108   : > { %6987 = vst [vmem:[#allocation10_spill] sm:$0xff] %v5713_v53  ;;  %v649_v59 = vmax.f32 %v527_v54, 0.0 }
 0x109   : > { %6988 = vst [vmem:[#allocation11_spill] sm:$0xff] %v5720_v56  ;;  %v648_v61 = vmax.f32 %v522_v58, 0.0  ;;  %v4416_v62 = vpop.f32.mrb[10].mxu0  ;;  %4467 = vmatprep.mubr.msk.f32.mxu0 %vm948_vm2, %v5720_v56  ;;  %4688 = vmatprep.mubr.msk.f32.mxu1 %vm948_vm2, %v5720_v56 }
 0x10a   : > { %v5729_v1 = vadd.f32 %v681_v57, %v649_v59  ;;  %v537_v2 = vadd.f32 %v4416_v62, %v5626_v0  ;;  %v531_v3 = vpop.f32.mrb[11].mxu0  ;;  %4468 = vmatmul.mubr.msk.f32.gmra.mrb[40].mxu0 %vm948_vm2, %v5713_v53  ;;  %4689 = vmatmul.mubr.msk.f32.gmra.mrb[6].mxu1 %vm948_vm2, %v5713_v53  ;;  %v691_v59 = vld [vmem:[%s5634_s26 + $0x98] sm:$0xff]  ;;  %v690_v62 = vld [vmem:[%s5634_s26 + $0x90] sm:$0xff] }
 0x10b   : > { %v5736_v4 = vadd.f32 %v680_v60, %v648_v61  ;;  %v532_v6 = vadd.f32 %v5626_v0, %v531_v3 }
 0x10c   : > { %6989 = vst [vmem:[#allocation12_spill] sm:$0xff] %v5729_v1  ;;  %v651_v7 = vmax.f32 %v537_v2, 0.0 }
 0x10d   : > { %6990 = vst [vmem:[#allocation13_spill] sm:$0xff] %v5736_v4  ;;  %v650_v9 = vmax.f32 %v532_v6, 0.0  ;;  %v4419_v10 = vpop.f32.mrb[12].mxu0  ;;  %4470 = vmatprep.mubr.msk.f32.mxu0 %vm948_vm2, %v5736_v4  ;;  %4691 = vmatprep.mubr.msk.f32.mxu1 %vm948_vm2, %v5736_v4 }
 0x10e   : > { %v5745_v11 = vadd.f32 %v683_v5, %v651_v7  ;;  %v547_v13 = vadd.f32 %v4419_v10, %v5626_v0  ;;  %v541_v14 = vpop.f32.mrb[13].mxu0  ;;  %4471 = vmatmul.mubr.msk.f32.gmra.mrb[42].mxu0 %vm948_vm2, %v5729_v1  ;;  %4692 = vmatmul.mubr.msk.f32.gmra.mrb[8].mxu1 %vm948_vm2, %v5729_v1 }
 0x10f   : > { %v5752_v16 = vadd.f32 %v682_v8, %v650_v9  ;;  %v542_v18 = vadd.f32 %v5626_v0, %v541_v14  ;;  %v693_v9 = vld [vmem:[%s5634_s26 + $0xa8] sm:$0xff]  ;;  %v692_v14 = vld [vmem:[%s5634_s26 + $0xa0] sm:$0xff] }
 0x110   : > { %6991 = vst [vmem:[#allocation14_spill] sm:$0xff] %v5745_v11  ;;  %v653_v19 = vmax.f32 %v547_v13, 0.0 }
 0x111   : > { %6992 = vst [vmem:[#allocation15_spill] sm:$0xff] %v5752_v16  ;;  %v652_v22 = vmax.f32 %v542_v18, 0.0  ;;  %v4422_v23 = vpop.f32.mrb[14].mxu0  ;;  %4473 = vmatprep.mubr.msk.f32.mxu0 %vm948_vm2, %v5752_v16  ;;  %4694 = vmatprep.mubr.msk.f32.mxu1 %vm948_vm2, %v5752_v16 }
 0x112   : > { %v5761_v24 = vadd.f32 %v685_v17, %v653_v19  ;;  %v557_v26 = vadd.f32 %v4422_v23, %v5626_v0  ;;  %v551_v27 = vpop.f32.mrb[15].mxu0  ;;  %4474 = vmatmul.mubr.msk.f32.gmra.mrb[44].mxu0 %vm948_vm2, %v5745_v11  ;;  %4695 = vmatmul.mubr.msk.f32.gmra.mrb[10].mxu1 %vm948_vm2, %v5745_v11 }
 0x113   : > { %v5768_v28 = vadd.f32 %v684_v20, %v652_v22  ;;  %v552_v31 = vadd.f32 %v5626_v0, %v551_v27 }
 0x114   : > { %6993 = vst [vmem:[#allocation16_spill] sm:$0xff] %v5761_v24  ;;  %v655_v33 = vmax.f32 %v557_v26, 0.0  ;;  %v695_v26 = vld [vmem:[%s5634_s26 + $0xb8] sm:$0xff] }
 0x115   : > { %6994 = vst [vmem:[#allocation17_spill] sm:$0xff] %v5768_v28  ;;  %v654_v36 = vmax.f32 %v552_v31, 0.0  ;;  %v4425_v37 = vpop.f32.mrb[16].mxu0  ;;  %4476 = vmatprep.mubr.msk.f32.mxu0 %vm948_vm2, %v5768_v28  ;;  %4697 = vmatprep.mubr.msk.f32.mxu1 %vm948_vm2, %v5768_v28  ;;  %v694_v31 = vld [vmem:[%s5634_s26 + $0xb0] sm:$0xff] }
 0x116   : > { %v5777_v40 = vadd.f32 %v687_v30, %v655_v33  ;;  %v567_v41 = vadd.f32 %v4425_v37, %v5626_v0  ;;  %v561_v43 = vpop.f32.mrb[17].mxu0  ;;  %4477 = vmatmul.mubr.msk.f32.gmra.mrb[46].mxu0 %vm948_vm2, %v5761_v24  ;;  %4698 = vmatmul.mubr.msk.f32.gmra.mrb[12].mxu1 %vm948_vm2, %v5761_v24 }
 0x117   : > { %v5784_v44 = vadd.f32 %v686_v34, %v654_v36  ;;  %v562_v47 = vadd.f32 %v5626_v0, %v561_v43 }
 0x118   : > { %6995 = vst [vmem:[#allocation18_spill] sm:$0xff] %v5777_v40  ;;  %v657_v48 = vmax.f32 %v567_v41, 0.0 }
 0x119   : > { %6996 = vst [vmem:[#allocation19_spill] sm:$0xff] %v5784_v44  ;;  %v656_v50 = vmax.f32 %v562_v47, 0.0  ;;  %v4428_v52 = vpop.f32.mrb[18].mxu0  ;;  %4479 = vmatprep.mubr.msk.f32.mxu0 %vm948_vm2, %v5784_v44  ;;  %4700 = vmatprep.mubr.msk.f32.mxu1 %vm948_vm2, %v5784_v44 }
 0x11a   : > { %v5793_v54 = vadd.f32 %v689_v46, %v657_v48  ;;  %v577_v55 = vadd.f32 %v4428_v52, %v5626_v0  ;;  %v571_v57 = vpop.f32.mrb[19].mxu0  ;;  %4480 = vmatmul.mubr.msk.f32.gmra.mrb[48].mxu0 %vm948_vm2, %v5777_v40  ;;  %4701 = vmatmul.mubr.msk.f32.gmra.mrb[14].mxu1 %vm948_vm2, %v5777_v40  ;;  %v697_v46 = vld [vmem:[%s5634_s26 + $0xc8] sm:$0xff] }
 0x11b   : > { %v5800_v58 = vadd.f32 %v688_v49, %v656_v50  ;;  %v572_v60 = vadd.f32 %v5626_v0, %v571_v57  ;;  %v696_v49 = vld [vmem:[%s5634_s26 + $0xc0] sm:$0xff] }
 0x11c   : > { %6997 = vst [vmem:[#allocation20_spill] sm:$0xff] %v5793_v54  ;;  %v659_v61 = vmax.f32 %v577_v55, 0.0 }
 0x11d   : > { %6998 = vst [vmem:[#allocation21_spill] sm:$0xff] %v5800_v58  ;;  %v658_v2 = vmax.f32 %v572_v60, 0.0  ;;  %v4431_v3 = vpop.f32.mrb[20].mxu0  ;;  %4482 = vmatprep.mubr.msk.f32.mxu0 %vm948_vm2, %v5800_v58  ;;  %4703 = vmatprep.mubr.msk.f32.mxu1 %vm948_vm2, %v5800_v58 }
 0x11e   : > { %v5809_v5 = vadd.f32 %v691_v59, %v659_v61  ;;  %v587_v6 = vadd.f32 %v4431_v3, %v5626_v0  ;;  %v581_v7 = vpop.f32.mrb[21].mxu0  ;;  %4483 = vmatmul.mubr.msk.f32.gmra.mrb[50].mxu0 %vm948_vm2, %v5793_v54  ;;  %4704 = vmatmul.mubr.msk.f32.gmra.mrb[16].mxu1 %vm948_vm2, %v5793_v54  ;;  %v699_v61 = vld [vmem:[%s5634_s26 + $0xd8] sm:$0xff]  ;;  %v698_v3 = vld [vmem:[%s5634_s26 + $0xd0] sm:$0xff] }
 0x11f   : > { %v5816_v8 = vadd.f32 %v690_v62, %v658_v2  ;;  %v582_v10 = vadd.f32 %v5626_v0, %v581_v7 }
 0x120   : > { %6999 = vst [vmem:[#allocation22_spill] sm:$0xff] %v5809_v5  ;;  %v661_v13 = vmax.f32 %v587_v6, 0.0 }
 0x121   : > { %7000 = vst [vmem:[#allocation23_spill] sm:$0xff] %v5816_v8  ;;  %v660_v17 = vmax.f32 %v582_v10, 0.0  ;;  %v4434_v18 = vpop.f32.mrb[22].mxu0  ;;  %4485 = vmatprep.mubr.msk.f32.mxu0 %vm948_vm2, %v5816_v8  ;;  %4706 = vmatprep.mubr.msk.f32.mxu1 %vm948_vm2, %v5816_v8 }
 0x122   : > { %v5825_v19 = vadd.f32 %v693_v9, %v661_v13  ;;  %v597_v20 = vadd.f32 %v4434_v18, %v5626_v0  ;;  %v591_v22 = vpop.f32.mrb[23].mxu0  ;;  %4486 = vmatmul.mubr.msk.f32.gmra.mrb[52].mxu0 %vm948_vm2, %v5809_v5  ;;  %4707 = vmatmul.mubr.msk.f32.gmra.mrb[18].mxu1 %vm948_vm2, %v5809_v5 }
 0x123   : > { %v5832_v23 = vadd.f32 %v692_v14, %v660_v17  ;;  %v592_v27 = vadd.f32 %v5626_v0, %v591_v22  ;;  %v701_v17 = vld [vmem:[%s5634_s26 + $0xe8] sm:$0xff]  ;;  %v700_v22 = vld [vmem:[%s5634_s26 + $0xe0] sm:$0xff] }
 0x124   : > { %7001 = vst [vmem:[#allocation24_spill] sm:$0xff] %v5825_v19  ;;  %v663_v30 = vmax.f32 %v597_v20, 0.0 }
 0x125   : > { %7002 = vst [vmem:[#allocation25_spill] sm:$0xff] %v5832_v23  ;;  %v662_v33 = vmax.f32 %v592_v27, 0.0  ;;  %v4437_v34 = vpop.f32.mrb[24].mxu0  ;;  %4488 = vmatprep.mubr.msk.f32.mxu0 %vm948_vm2, %v5832_v23  ;;  %4709 = vmatprep.mubr.msk.f32.mxu1 %vm948_vm2, %v5832_v23 }
 0x126   : > { %v5841_v36 = vadd.f32 %v695_v26, %v663_v30  ;;  %v607_v37 = vadd.f32 %v4437_v34, %v5626_v0  ;;  %v601_v41 = vpop.f32.mrb[25].mxu0  ;;  %4489 = vmatmul.mubr.msk.f32.gmra.mrb[54].mxu0 %vm948_vm2, %v5825_v19  ;;  %4710 = vmatmul.mubr.msk.f32.gmra.mrb[20].mxu1 %vm948_vm2, %v5825_v19  ;;  %v5886_v26 = vrot.slane %v6926_v51, 7 }
 0x127   : > { %v5848_v43 = vadd.f32 %v694_v31, %v662_v33  ;;  %v602_v47 = vadd.f32 %v5626_v0, %v601_v41  ;;  %v703_v41 = vld [vmem:[%s5634_s26 + $0xf8] sm:$0xff] }
 0x128   : > { %7003 = vst [vmem:[#allocation26_spill] sm:$0xff] %v5841_v36  ;;  %v665_v48 = vmax.f32 %v607_v37, 0.0  ;;  %7009 = vst [vmem:[#allocation32_spill] sm:$0xff] %v5886_v26 }
 0x129   : > { %7004 = vst [vmem:[#allocation27_spill] sm:$0xff] %v5848_v43  ;;  %v664_v50 = vmax.f32 %v602_v47, 0.0  ;;  %v4440_v52 = vpop.f32.mrb[26].mxu0  ;;  %4491 = vmatprep.mubr.msk.f32.mxu0 %vm948_vm2, %v5848_v43  ;;  %4712 = vmatprep.mubr.msk.f32.mxu1 %vm948_vm2, %v5848_v43 }
 0x12a   : > { %v5857_v55 = vadd.f32 %v697_v46, %v665_v48  ;;  %v617_v57 = vadd.f32 %v4440_v52, %v5626_v0  ;;  %v611_v59 = vpop.f32.mrb[27].mxu0  ;;  %4492 = vmatmul.mubr.msk.f32.gmra.mrb[56].mxu0 %vm948_vm2, %v5841_v36  ;;  %4713 = vmatmul.mubr.msk.f32.gmra.mrb[22].mxu1 %vm948_vm2, %v5841_v36  ;;  %v702_v48 = vld [vmem:[%s5634_s26 + $0xf0] sm:$0xff]  ;;  %s6747_s26 = scalar_lea.vmem [#allocation2], %s3664_s20 }
 0x12b   : > { %v5864_v60 = vadd.f32 %v696_v49, %v664_v50  ;;  %v612_v62 = vadd.f32 %v5626_v0, %v611_v59  ;;  %v5906_v49 = vsel %vm769_vm3, 0.0, %v5886_v26  ;;  %s3586_s28 = sshll.u32 %s6747_s26, 4  ;;  %s6870_s28 = int_to_ptr.vmem [resolvable:$true] %s3586_s28 }
 0x12c   : > { %7005 = vst [vmem:[#allocation28_spill] sm:$0xff] %v5857_v55  ;;  %v667_v2 = vmax.f32 %v617_v57, 0.0  ;;  %7012 = vst [vmem:[#allocation35_spill] sm:$0xff] %v5906_v49  ;;  %v3772_v57 = vld [vmem:[%s6923_s4 + $0x58] sm:$0xff]  ;;  %s5329_s10 = scalar_lea.vmem %s6870_s28, 4096  ;;  %p5336_p0 = scmp.lt.s32.totalorder %s6870_s28, %s5334_s12 }
 0x12d   : > { %7006 = vst [vmem:[#allocation29_spill] sm:$0xff] %v5864_v60  ;;  %v666_v6 = vmax.f32 %v612_v62, 0.0  ;;  %v4443_v7 = vpop.f32.mrb[28].mxu0  ;;  %4494 = vmatprep.mubr.msk.f32.mxu0 %vm948_vm2, %v5864_v60  ;;  %4715 = vmatprep.mubr.msk.f32.mxu1 %vm948_vm2, %v5864_v60  ;;  %v3916_v62 = vld [vmem:[%s6923_s4 + $0xd8] sm:$0xff]  ;;  %p5330_p11 = scmp.ne.s32.totalorder %s6870_s28, %s5329_s10  ;;  %p5337_p1 = scmp.lt.s32.totalorder %s5335_s13, %s5329_s10 }
 0x12e   : > { %v5873_v9 = vadd.f32 %v699_v61, %v667_v2  ;;  %v627_v10 = vadd.f32 %v4443_v7, %v5626_v0  ;;  %v621_v13 = vpop.f32.mrb[29].mxu0  ;;  %4495 = vmatmul.mubr.msk.f32.gmra.mrb[58].mxu0 %vm948_vm2, %v5857_v55  ;;  %4716 = vmatmul.mubr.msk.f32.gmra.mrb[24].mxu1 %vm948_vm2, %v5857_v55  ;;  %v3915_v61 = vld [vmem:[%s6923_s4 + $0xd0] sm:$0xff]  ;;  %v860_v7 = vrot.slane %v5675_v32, 1 }
 0x12f   : > { %v5880_v14 = vadd.f32 %v698_v3, %v666_v6  ;;  %v622_v18 = vadd.f32 %v5626_v0, %v621_v13  ;;  %v5943_v3 = vsel %vm769_vm3, 0.0, %v772_v25  ;;  %v775_v6 = vrot.slane %v5675_v32, 7  ;;  %p5331_p12 = pnand %p5330_p11, %p5470_p5  ;;  %p5338_p2 = por %p5337_p1, %p5336_p0 }
 0x130   : > { %7007 = vst [vmem:[#allocation30_spill] sm:$0xff] %v5873_v9  ;;  %v669_v20 = vmax.f32 %v627_v10, 0.0  ;;  %7013 = vst [vmem:[#allocation36_spill] sm:$0xff] %v5943_v3  ;;  %v861_v10 = vrot.slane %v5668_v29, 1  ;;  %v5011_v13 = vpack.c.bf16 %v3916_v62, %v3915_v61  ;;  %v5959_v25 = vsel %vm854_vm4, %v858_v21, 0.0 }
 0x131   : > { %7008 = vst [vmem:[#allocation31_spill] sm:$0xff] %v5880_v14  ;;  %v668_v27 = vmax.f32 %v622_v18, 0.0  ;;  %v4446_v30 = vpop.f32.mrb[30].mxu0  ;;  %4497 = vmatprep.mubr.msk.f32.mxu0 %vm948_vm2, %v5880_v14  ;;  %4718 = vmatprep.mubr.msk.f32.mxu1 %vm948_vm2, %v5880_v14  ;;  %v3950_v18 = vld [vmem:[%s6923_s4 + $0xe8] sm:$0xff]  ;;  %v5976_v12 = vsel %vm769_vm3, 0.0, %v775_v6  ;;  %v778_v21 = vrot.slane %v5703_v45, 7  ;;  %p5332_p13 = pneg %p5331_p12 }
 0x132   : > { %v5892_v31 = vadd.f32 %v701_v17, %v669_v20  ;;  %v637_v33 = vadd.f32 %v4446_v30, %v5626_v0  ;;  %v631_v34 = vpop.f32.mrb[31].mxu0  ;;  %4498 = vmatmul.mubr.msk.f32.gmra.mrb[60].mxu0 %vm948_vm2, %v5873_v9  ;;  %4719 = vmatmul.mubr.msk.f32.gmra.mrb[26].mxu1 %vm948_vm2, %v5873_v9  ;;  %v776_v17 = vrot.slane %v5668_v29, 7  ;;  %v3806_v20 = vld [vmem:[%s6923_s4 + $0x68] sm:$0xff]  ;;  %v5985_v30 = vsel %vm854_vm4, %v860_v7, %v861_v10 }
 0x133   : > { %v5899_v37 = vadd.f32 %v700_v22, %v668_v27  ;;  %v632_v46 = vadd.f32 %v5626_v0, %v631_v34  ;;  %v3771_v0 = vld [vmem:[%s6923_s4 + $0x50] sm:$0xff]  ;;  %v863_v22 = vrot.slane %v5703_v45, 1  ;;  %v864_v27 = vrot.slane %v5696_v42, 1  ;;  %p5339_p3 = pnand %p5338_p2, %p5332_p13 }
 0x134   : > { %7010 = vst [vmem:[#allocation33_spill] sm:$0xff] %v5892_v31  ;;  %v671_v47 = vmax.f32 %v637_v33, 0.0  ;;  %v4979_v2 = vpack.c.bf16 %v3772_v57, %v3771_v0  ;;  %v5989_v33 = vpack.c.bf16 %v3950_v18, %v3949_v15  ;;  %v866_v0 = vrot.slane %v5720_v56, 1 }
 0x135   : > { %7011 = vst [vmem:[#allocation34_spill] sm:$0xff] %v5899_v37  ;;  %v670_v50 = vmax.f32 %v632_v46, 0.0  ;;  %4500 = vmatprep.mubr.msk.f32.mxu0 %vm948_vm2, %v5899_v37  ;;  %4721 = vmatprep.mubr.msk.f32.mxu1 %vm948_vm2, %v5899_v37  ;;  %v5997_v46 = vsel %vm854_vm4, %v861_v10, 0.0  ;;  %v867_v57 = vrot.slane %v5713_v53, 1  ;;  %v6022_v62 = vsel %vm854_vm4, %v864_v27, 0.0 }
 0x136   : > { %v5912_v52 = vadd.f32 %v703_v41, %v671_v47  ;;  %4501 = vmatmul.mubr.msk.f32.gmra.mrb[62].mxu0 %vm948_vm2, %v5892_v31  ;;  %4722 = vmatmul.mubr.msk.f32.gmra.mrb[28].mxu1 %vm948_vm2, %v5892_v31  ;;  %v5994_v41 = vsel %vm769_vm3, %v775_v6, %v776_v17  ;;  %v781_v47 = vrot.slane %v5720_v56, 7  ;;  %v782_v6 = vrot.slane %v5713_v53, 7 }
 0x137   : > { %v5924_v59 = vadd.f32 %v702_v48, %v670_v50  ;;  %4511 = vmatprep.mubr.msk.f32.mxu0 %vm948_vm2, %v5906_v49  ;;  %v6006_v48 = vsel %vm769_vm3, 0.0, %v778_v21  ;;  %v6009_v50 = vsel %vm854_vm4, %v863_v22, %v864_v27  ;;  %v6034_v7 = vsel %vm854_vm4, %v866_v0, %v867_v57 }
 0x138   : > { %v784_v10 = vrot.slane %v5736_v4, 7  ;;  %v870_v15 = vrot.slane %v5729_v1, 1  ;;  %v6044_v17 = vsel %vm769_vm3, %v781_v47, %v782_v6  ;;  %v6047_v18 = vsel %vm854_vm4, %v867_v57, 0.0 }
 0x139   : > { %4724 = vmatprep.mubr.msk.f32.mxu1 %vm948_vm2, %v5924_v59  ;;  %v872_v27 = vrot.slane %v5752_v16, 1  ;;  %v788_v6 = vrot.slane %v5745_v11, 7  ;;  %v799_v56 = vrot.slane %v5816_v8, 7  ;;  %v805_v32 = vrot.slane %v5848_v43, 7 }
 0x13a   : > { %4512 = vmatmul.mubr.msk.f32.vlgmr.msra.gmra.mrb[32].mxu0 %vm948_vm2, %v5886_v26  ;;  %4725 = vmatmul.mubr.msk.f32.gmra.mrb[30].mxu1 %vm948_vm2, %v5912_v52  ;;  %v6071_v0 = vsel %vm854_vm4, %v870_v15, 0.0 }
 0x13b   : > { %4514 = vmatprep.mubr.msk.f32.mxu0 %vm948_vm2, %v5943_v3  ;;  %4735 = vmatprep.mubr.msk.f32.mxu1 %vm948_vm2, %v5682_v35  ;;  %v6170_v45 = vsel %vm769_vm3, 0.0, %v799_v56  ;;  %v811_v3 = vrot.slane %v5880_v14, 7 }
 0x13c   : > { %4978 = vmatpush3.bf16.msra.mxu0 %v5621_v63  ;;  %v3805_v63 = vld [vmem:[%s6923_s4 + $0x60] sm:$0xff] }
 0x13d   : > { %4980 = vmatprep.subr.bf16.mxu0 %v4979_v2  ;;  %v5991_v34 = vpack.c.bf16 %v3806_v20, %v3805_v63  ;;  %v785_v63 = vrot.slane %v5729_v1, 7  ;;  %v787_v20 = vrot.slane %v5752_v16, 7  ;;  %v793_v16 = vrot.slane %v5784_v44, 7 }
 0x13e   : > { %4515 = vmatmul.mubr.msk.f32.gmra.mrb[34].mxu0 %vm948_vm2, %v5690_v39  ;;  %4736 = vmatmul.mubr.msk.f32.vlgmr.msra.gmra.mrb[0].mxu1 %vm948_vm2, %v5959_v25  ;;  %v6218_v39 = vsel %vm769_vm3, 0.0, %v805_v32 }
 0x13f   : > { %5010 = vmatpush3.bf16.msra.mxu1 %v5685_v38  ;;  %4517 = vmatprep.mubr.msk.f32.mxu0 %vm948_vm2, %v5976_v12  ;;  %v779_v38 = vrot.slane %v5696_v42, 7  ;;  %v6074_v57 = vsel %vm769_vm3, 0.0, %v787_v20  ;;  %v6092_v51 = vsel %vm769_vm3, %v787_v20, %v788_v6  ;;  %v878_v20 = vrot.slane %v5784_v44, 1 }
 0x140   : > { %4738 = vmatprep.mubr.msk.f32.mxu1 %vm948_vm2, %v5985_v30  ;;  %5012 = vmatprep.subr.bf16.mxu1 %v5011_v13 }
 0x141   : > { %4982 = vmatpush3.bf16.msra.mxu0 %v4979_v2  ;;  %v6019_v61 = vsel %vm769_vm3, %v778_v21, %v779_v38  ;;  %v6025_v2 = vsel %vm769_vm3, 0.0, %v781_v47  ;;  %v6056_v21 = vsel %vm769_vm3, 0.0, %v784_v10  ;;  %v873_v38 = vrot.slane %v5745_v11, 1 }
 0x142   : > { %4518 = vmatmul.mubr.msk.f32.gmra.mrb[36].mxu0 %vm948_vm2, %v5994_v41  ;;  %4739 = vmatmul.mubr.msk.f32.gmra.mrb[2].mxu1 %vm948_vm2, %v5997_v46  ;;  %v6068_v47 = vsel %vm769_vm3, %v784_v10, %v785_v63  ;;  %v790_v10 = vrot.slane %v5768_v28, 7  ;;  %v875_v63 = vrot.slane %v5768_v28, 1 }
 0x143   : > { %4520 = vmatprep.mubr.msk.f32.mxu0 %vm948_vm2, %v6006_v48  ;;  %4741 = vmatprep.mubr.msk.f32.mxu1 %vm948_vm2, %v6009_v50  ;;  %v6095_v11 = vsel %vm854_vm4, %v873_v38, 0.0 }
 0x144   : > { %5014 = vmatpush3.bf16.msra.mxu1 %v5011_v13  ;;  %4984 = vmatprep.subr.bf16.mxu0 %v5991_v34  ;;  %v869_v13 = vrot.slane %v5736_v4, 1  ;;  %v6104_v28 = vsel %vm769_vm3, 0.0, %v790_v10  ;;  %v6122_v4 = vsel %vm769_vm3, 0.0, %v793_v16 }
 0x145   : > { %5016 = vmatprep.subr.bf16.mxu1 %v5989_v33 }
 0x146   : > { %4521 = vmatmul.mubr.msk.f32.gmra.mrb[38].mxu0 %vm948_vm2, %v6019_v61  ;;  %4742 = vmatmul.mubr.msk.f32.gmra.mrb[4].mxu1 %vm948_vm2, %v6022_v62  ;;  %v6059_v22 = vsel %vm854_vm4, %v869_v13, %v870_v15  ;;  %v6082_v13 = vsel %vm854_vm4, %v872_v27, %v873_v38  ;;  %v876_v15 = vrot.slane %v5761_v24, 1  ;;  %v791_v27 = vrot.slane %v5761_v24, 7 }
 0x147   : > { %4523 = vmatprep.mubr.msk.f32.mxu0 %vm948_vm2, %v6025_v2  ;;  %4744 = vmatprep.mubr.msk.f32.mxu1 %vm948_vm2, %v6034_v7  ;;  %v879_v38 = vrot.slane %v5777_v40, 1 }
 0x148   : > { %v6107_v1 = vsel %vm854_vm4, %v875_v63, %v876_v15  ;;  %v6116_v6 = vsel %vm769_vm3, %v790_v10, %v791_v27  ;;  %v6119_v24 = vsel %vm854_vm4, %v876_v15, 0.0  ;;  %v794_v63 = vrot.slane %v5777_v40, 7 }
 0x149   : > { %v6130_v44 = vsel %vm854_vm4, %v878_v20, %v879_v38  ;;  %v796_v10 = vrot.slane %v5800_v58, 7  ;;  %v881_v27 = vrot.slane %v5800_v58, 1  ;;  %v882_v15 = vrot.slane %v5793_v54, 1 }
 0x14a   : > { %4524 = vmatmul.mubr.msk.f32.gmra.mrb[40].mxu0 %vm948_vm2, %v6044_v17  ;;  %4745 = vmatmul.mubr.msk.f32.gmra.mrb[6].mxu1 %vm948_vm2, %v6047_v18  ;;  %v6140_v40 = vsel %vm769_vm3, %v793_v16, %v794_v63  ;;  %v6143_v53 = vsel %vm854_vm4, %v879_v38, 0.0  ;;  %v797_v20 = vrot.slane %v5793_v54, 7  ;;  %v884_v16 = vrot.slane %v5816_v8, 1 }
 0x14b   : > { %4526 = vmatprep.mubr.msk.f32.mxu0 %vm948_vm2, %v6056_v21  ;;  %4747 = vmatprep.mubr.msk.f32.mxu1 %vm948_vm2, %v6059_v22  ;;  %v6152_v58 = vsel %vm769_vm3, 0.0, %v796_v10  ;;  %v6155_v42 = vsel %vm854_vm4, %v881_v27, %v882_v15  ;;  %v885_v38 = vrot.slane %v5809_v5, 1  ;;  %v6167_v54 = vsel %vm854_vm4, %v882_v15, 0.0 }
 0x14c   : > { %v6164_v63 = vsel %vm769_vm3, %v796_v10, %v797_v20  ;;  %v800_v27 = vrot.slane %v5809_v5, 7  ;;  %v802_v10 = vrot.slane %v5832_v23, 7  ;;  %v887_v20 = vrot.slane %v5832_v23, 1 }
 0x14d   : > { %v6178_v8 = vsel %vm854_vm4, %v884_v16, %v885_v38  ;;  %v888_v15 = vrot.slane %v5825_v19, 1  ;;  %v6191_v29 = vsel %vm854_vm4, %v885_v38, 0.0  ;;  %v803_v16 = vrot.slane %v5825_v19, 7 }
 0x14e   : > { %4527 = vmatmul.mubr.msk.f32.gmra.mrb[42].mxu0 %vm948_vm2, %v6068_v47  ;;  %4748 = vmatmul.mubr.msk.f32.gmra.mrb[8].mxu1 %vm948_vm2, %v6071_v0  ;;  %v6188_v5 = vsel %vm769_vm3, %v799_v56, %v800_v27  ;;  %v6200_v23 = vsel %vm769_vm3, 0.0, %v802_v10  ;;  %v890_v56 = vrot.slane %v5848_v43, 1  ;;  %v891_v38 = vrot.slane %v5841_v36, 1 }
 0x14f   : > { %4529 = vmatprep.mubr.msk.f32.mxu0 %vm948_vm2, %v6074_v57  ;;  %4750 = vmatprep.mubr.msk.f32.mxu1 %vm948_vm2, %v6082_v13  ;;  %v6203_v26 = vsel %vm854_vm4, %v887_v20, %v888_v15  ;;  %v6212_v27 = vsel %vm769_vm3, %v802_v10, %v803_v16  ;;  %v6215_v19 = vsel %vm854_vm4, %v888_v15, 0.0  ;;  %v806_v20 = vrot.slane %v5841_v36, 7 }
 0x150   : > { %v6226_v43 = vsel %vm854_vm4, %v890_v56, %v891_v38  ;;  %v808_v10 = vrot.slane %v5864_v60, 7  ;;  %v893_v16 = vrot.slane %v5864_v60, 1  ;;  %v894_v15 = vrot.slane %v5857_v55, 1 }
 0x151   : > { %7014 = vst [vmem:[#allocation37_spill] sm:$0xff] %v6226_v43  ;;  %v6236_v36 = vsel %vm769_vm3, %v805_v32, %v806_v20  ;;  %v6239_v49 = vsel %vm854_vm4, %v891_v38, 0.0  ;;  %v809_v56 = vrot.slane %v5857_v55, 7  ;;  %v896_v32 = vrot.slane %v5880_v14, 1 }
 0x152   : > { %4530 = vmatmul.mubr.msk.f32.gmra.mrb[44].mxu0 %vm948_vm2, %v6092_v51  ;;  %4751 = vmatmul.mubr.msk.f32.gmra.mrb[10].mxu1 %vm948_vm2, %v6095_v11  ;;  %7015 = vst [vmem:[#allocation38_spill] sm:$0xff] %v6239_v49  ;;  %v6248_v60 = vsel %vm769_vm3, 0.0, %v808_v10  ;;  %v897_v38 = vrot.slane %v5873_v9, 1  ;;  %v6263_v55 = vsel %vm854_vm4, %v894_v15, 0.0 }
 0x153   : > { %4532 = vmatprep.mubr.msk.f32.mxu0 %vm948_vm2, %v6104_v28  ;;  %4753 = vmatprep.mubr.msk.f32.mxu1 %vm948_vm2, %v6107_v1  ;;  %v6260_v20 = vsel %vm769_vm3, %v808_v10, %v809_v56  ;;  %7016 = vst [vmem:[#allocation39_spill] sm:$0xff] %v6263_v55  ;;  %v814_v10 = vrot.slane %v5899_v37, 7  ;;  %v899_v56 = vrot.slane %v5899_v37, 1 }
 0x154   : > { %v6274_v14 = vsel %vm854_vm4, %v896_v32, %v897_v38  ;;  %v815_v32 = vrot.slane %v5892_v31, 7 }
 0x155   : > { %7018 = vst [vmem:[#allocation41_spill] sm:$0xff] %v6274_v14  ;;  %v6295_v37 = vsel %vm769_vm3, 0.0, %v814_v10 }
 0x156   : > { %4533 = vmatmul.mubr.msk.f32.gmra.mrb[46].mxu0 %vm948_vm2, %v6116_v6  ;;  %4754 = vmatmul.mubr.msk.f32.gmra.mrb[12].mxu1 %vm948_vm2, %v6119_v24 }
 0x157   : > { %4535 = vmatprep.mubr.msk.f32.mxu0 %vm948_vm2, %v6122_v4  ;;  %4756 = vmatprep.mubr.msk.f32.mxu1 %vm948_vm2, %v6130_v44 }
 0x15a   : > { %4536 = vmatmul.mubr.msk.f32.gmra.mrb[48].mxu0 %vm948_vm2, %v6140_v40  ;;  %4757 = vmatmul.mubr.msk.f32.gmra.mrb[14].mxu1 %vm948_vm2, %v6143_v53 }
 0x15b   : > { %4538 = vmatprep.mubr.msk.f32.mxu0 %vm948_vm2, %v6152_v58  ;;  %4759 = vmatprep.mubr.msk.f32.mxu1 %vm948_vm2, %v6155_v42 }
 0x15e   : > { %4539 = vmatmul.mubr.msk.f32.gmra.mrb[50].mxu0 %vm948_vm2, %v6164_v63  ;;  %4760 = vmatmul.mubr.msk.f32.gmra.mrb[16].mxu1 %vm948_vm2, %v6167_v54 }
 0x15f   : > { %4541 = vmatprep.mubr.msk.f32.mxu0 %vm948_vm2, %v6170_v45  ;;  %4762 = vmatprep.mubr.msk.f32.mxu1 %vm948_vm2, %v6178_v8 }
 0x162   : > { %4542 = vmatmul.mubr.msk.f32.gmra.mrb[52].mxu0 %vm948_vm2, %v6188_v5  ;;  %4763 = vmatmul.mubr.msk.f32.gmra.mrb[18].mxu1 %vm948_vm2, %v6191_v29 }
 0x163   : > { %4544 = vmatprep.mubr.msk.f32.mxu0 %vm948_vm2, %v6200_v23  ;;  %4765 = vmatprep.mubr.msk.f32.mxu1 %vm948_vm2, %v6203_v26 }
 0x166   : > { %4545 = vmatmul.mubr.msk.f32.gmra.mrb[54].mxu0 %vm948_vm2, %v6212_v27  ;;  %4766 = vmatmul.mubr.msk.f32.gmra.mrb[20].mxu1 %vm948_vm2, %v6215_v19 }
 0x167   : > { %4547 = vmatprep.mubr.msk.f32.mxu0 %vm948_vm2, %v6218_v39  ;;  %4768 = vmatprep.mubr.msk.f32.mxu1 %vm948_vm2, %v6226_v43  ;;  %v6251_v43 = vsel %vm854_vm4, %v893_v16, %v894_v15  ;;  %v812_v16 = vrot.slane %v5873_v9, 7  ;;  %v900_v15 = vrot.slane %v5892_v31, 1 }
 0x169   : > { %v6284_v9 = vsel %vm769_vm3, %v811_v3, %v812_v16  ;;  %v903_v16 = vrot.slane %v5912_v52, 1 }
 0x16a   : > { %4548 = vmatmul.mubr.msk.f32.gmra.mrb[56].mxu0 %vm948_vm2, %v6236_v36  ;;  %4769 = vmatmul.mubr.msk.f32.gmra.mrb[22].mxu1 %vm948_vm2, %v6239_v49  ;;  %v6266_v49 = vsel %vm769_vm3, 0.0, %v811_v3  ;;  %v902_v3 = vrot.slane %v5924_v59, 1 }
 0x16b   : > { %4550 = vmatprep.mubr.msk.f32.mxu0 %vm948_vm2, %v6248_v60  ;;  %4771 = vmatprep.mubr.msk.f32.mxu1 %vm948_vm2, %v6251_v43  ;;  %7017 = vst [vmem:[#allocation40_spill] sm:$0xff] %v6266_v49 }
 0x16e   : > { %4551 = vmatmul.mubr.msk.f32.gmra.mrb[58].mxu0 %vm948_vm2, %v6260_v20  ;;  %4772 = vmatmul.mubr.msk.f32.gmra.mrb[24].mxu1 %vm948_vm2, %v6263_v55  ;;  %v6287_v55 = vsel %vm854_vm4, %v897_v38, 0.0  ;;  %v7021_v38 = vmov 0.0  }
 0x16f   : > { %4553 = vmatprep.mubr.msk.f32.mxu0 %vm948_vm2, %v6266_v49  ;;  %4774 = vmatprep.mubr.msk.f32.mxu1 %vm948_vm2, %v6274_v14  ;;  %7019 = vst [vmem:[#allocation42_spill] sm:$0xff] %v6287_v55  ;;  %v6298_v49 = vsel %vm854_vm4, %v899_v56, %v900_v15  ;;  %v6307_v31 = vrot.slane %v7021_v38, 1  ;;  %v6313_v14 = vsel %vm854_vm4, %v900_v15, 0.0  ;;  %v6320_v56 = vsel %vm854_vm4, %v902_v3, %v903_v16  ;;  %v3807_v38 = vld [vmem:[%s6923_s4 + $0x70] sm:$0xff] }
 0x170   : > { %7020 = vst [vmem:[#allocation43_spill] sm:$0xff] %v6298_v49  ;;  %7023 = vst [vmem:[#allocation45_spill] sm:$0xff] %v6313_v14  ;;  %v3951_v3 = vld [vmem:[%s6923_s4 + $0xf0] sm:$0xff] }
 0x171   : > { %7022 = vst [vmem:[#allocation44_spill] sm:$0xff] %v6307_v31  ;;  %7024 = vst [vmem:[#allocation46_spill] sm:$0xff] %v6320_v56  ;;  %v6334_v15 = vsel %vm854_vm4, %v6307_v31, 0.0 }
 0x172   : > { %4554 = vmatmul.mubr.msk.f32.gmra.mrb[60].mxu0 %vm948_vm2, %v6284_v9  ;;  %4775 = vmatmul.mubr.msk.f32.gmra.mrb[26].mxu1 %vm948_vm2, %v6287_v55  ;;  %v6310_v55 = vsel %vm769_vm3, %v814_v10, %v815_v32  ;;  %v3808_v10 = vld [vmem:[%s6923_s4 + $0x78] sm:$0xff]  ;;  %7025 = vst [vmem:[#allocation47_spill] sm:$0xff] %v6334_v15  ;;  %v6337_v32 = vsel %vm854_vm4, %v903_v16, 0.0 }
 0x173   : > { %4556 = vmatprep.mubr.msk.f32.mxu0 %vm948_vm2, %v6295_v37  ;;  %4777 = vmatprep.mubr.msk.f32.mxu1 %vm948_vm2, %v6298_v49  ;;  %7026 = vst [vmem:[#allocation48_spill] sm:$0xff] %v6337_v32  ;;  %v4987_v49 = vpack.c.bf16 %v3808_v10, %v3807_v38  ;;  %v3983_v38 = vld [vmem:[%s6923_s4 + $0x100] sm:$0xff]  ;;  %v817_v10 = vrot.slane %v5924_v59, 7 }
 0x176   : > { %4557 = vmatmul.mubr.msk.f32.gmra.mrb[62].mxu0 %vm948_vm2, %v6310_v55  ;;  %4778 = vmatmul.mubr.msk.f32.gmra.mrb[28].mxu1 %vm948_vm2, %v6313_v14  ;;  %v3952_v14 = vld [vmem:[%s6923_s4 + $0xf8] sm:$0xff] }
 0x177   : > { %4780 = vmatprep.mubr.msk.f32.mxu1 %vm948_vm2, %v6320_v56  ;;  %4567 = vmatprep.mubr.msk.f32.mxu0 %vm948_vm2, %v6307_v31  ;;  %v5019_v16 = vpack.c.bf16 %v3952_v14, %v3951_v3  ;;  %v7031_v3 = vld [vmem:[#allocation41_spill] sm:$0xff]  ;;  %v7035_v56 = vld [vmem:[#allocation36_spill] sm:$0xff] }
 0x17a   : > { %4568 = vmatmul.mubr.msk.f32.vlgmr.msra.gmra.mrb[32].mxu0 %vm948_vm2, %v6334_v15  ;;  %4781 = vmatmul.mubr.msk.f32.gmra.mrb[30].mxu1 %vm948_vm2, %v6337_v32  ;;  %v7033_v15 = vld [vmem:[#allocation43_spill] sm:$0xff]  ;;  %v7034_v32 = vld [vmem:[#allocation45_spill] sm:$0xff] }
 0x17b   : > { %4570 = vmatprep.mubr.msk.f32.mxu0 %vm948_vm2, %v5682_v35  ;;  %4791 = vmatprep.mubr.msk.f32.mxu1 %vm948_vm2, %v5976_v12  ;;  %v3984_v35 = vld [vmem:[%s6923_s4 + $0x108] sm:$0xff] }
 0x17c   : > { %4986 = vmatpush3.bf16.msra.mxu0 %v5991_v34  ;;  %v6369_v14 = vpack.c.bf16 %v3984_v35, %v3983_v38  ;;  %v7030_v34 = vld [vmem:[#allocation39_spill] sm:$0xff]  ;;  %v7032_v38 = vld [vmem:[#allocation42_spill] sm:$0xff]  ;;  %v6475_v35 = vsel %vm769_vm3, 0.0, %v817_v10 }
 0x17d   : > { %4988 = vmatprep.subr.bf16.mxu0 %v4987_v49 }
 0x17e   : > { %4571 = vmatmul.mubr.msk.f32.gmra.mrb[34].mxu0 %vm948_vm2, %v5959_v25  ;;  %4792 = vmatmul.mubr.msk.f32.vlgmr.msra.gmra.mrb[0].mxu1 %vm948_vm2, %v5994_v41  ;;  %v7028_v25 = vld [vmem:[#allocation38_spill] sm:$0xff] }
 0x17f   : > { %5018 = vmatpush3.bf16.msra.mxu1 %v5989_v33  ;;  %4573 = vmatprep.mubr.msk.f32.mxu0 %vm948_vm2, %v5985_v30  ;;  %v7029_v33 = vld [vmem:[#allocation40_spill] sm:$0xff] }
 0x180   : > { %4794 = vmatprep.mubr.msk.f32.mxu1 %vm948_vm2, %v6006_v48  ;;  %5020 = vmatprep.subr.bf16.mxu1 %v5019_v16 }
 0x181   : > { %4990 = vmatpush3.bf16.msra.mxu0 %v4987_v49  ;;  %v7027_v49 = vld [vmem:[#allocation37_spill] sm:$0xff] }
 0x182   : > { %4574 = vmatmul.mubr.msk.f32.gmra.mrb[36].mxu0 %vm948_vm2, %v5997_v46  ;;  %4795 = vmatmul.mubr.msk.f32.gmra.mrb[2].mxu1 %vm948_vm2, %v6019_v61 }
 0x183   : > { %4576 = vmatprep.mubr.msk.f32.mxu0 %vm948_vm2, %v6009_v50  ;;  %4797 = vmatprep.mubr.msk.f32.mxu1 %vm948_vm2, %v6025_v2 }
 0x184   : > { %5022 = vmatpush3.bf16.msra.mxu1 %v5019_v16  ;;  %v818_v16 = vrot.slane %v5912_v52, 7 }
 0x185   : > { %5024 = vmatprep.subr.bf16.mxu1 %v6369_v14 }
 0x186   : > { %4577 = vmatmul.mubr.msk.f32.gmra.mrb[38].mxu0 %vm948_vm2, %v6022_v62  ;;  %4798 = vmatmul.mubr.msk.f32.gmra.mrb[4].mxu1 %vm948_vm2, %v6044_v17  ;;  %v6482_v31 = vsel %vm769_vm3, %v817_v10, %v818_v16  ;;  %v3986_v10 = vld [vmem:[%s6923_s4 + $0x118] sm:$0xff]  ;;  %v7037_v16 = vld [vmem:[#allocation7_spill] sm:$0xff] }
 0x187   : > { %4579 = vmatprep.mubr.msk.f32.mxu0 %vm948_vm2, %v6034_v7  ;;  %4800 = vmatprep.mubr.msk.f32.mxu1 %vm948_vm2, %v6056_v21 }
 0x18a   : > { %4580 = vmatmul.mubr.msk.f32.gmra.mrb[40].mxu0 %vm948_vm2, %v6047_v18  ;;  %4801 = vmatmul.mubr.msk.f32.gmra.mrb[6].mxu1 %vm948_vm2, %v6068_v47 }
 0x18b   : > { %4582 = vmatprep.mubr.msk.f32.mxu0 %vm948_vm2, %v6059_v22  ;;  %4803 = vmatprep.mubr.msk.f32.mxu1 %vm948_vm2, %v6074_v57 }
 0x18e   : > { %4583 = vmatmul.mubr.msk.f32.gmra.mrb[42].mxu0 %vm948_vm2, %v6071_v0  ;;  %4804 = vmatmul.mubr.msk.f32.gmra.mrb[8].mxu1 %vm948_vm2, %v6092_v51 }
 0x18f   : > { %4585 = vmatprep.mubr.msk.f32.mxu0 %vm948_vm2, %v6082_v13  ;;  %4806 = vmatprep.mubr.msk.f32.mxu1 %vm948_vm2, %v6104_v28 }
 0x192   : > { %4586 = vmatmul.mubr.msk.f32.gmra.mrb[44].mxu0 %vm948_vm2, %v6095_v11  ;;  %4807 = vmatmul.mubr.msk.f32.gmra.mrb[10].mxu1 %vm948_vm2, %v6116_v6 }
 0x193   : > { %4588 = vmatprep.mubr.msk.f32.mxu0 %vm948_vm2, %v6107_v1  ;;  %4809 = vmatprep.mubr.msk.f32.mxu1 %vm948_vm2, %v6122_v4 }
 0x196   : > { %4589 = vmatmul.mubr.msk.f32.gmra.mrb[46].mxu0 %vm948_vm2, %v6119_v24  ;;  %4810 = vmatmul.mubr.msk.f32.gmra.mrb[12].mxu1 %vm948_vm2, %v6140_v40 }
 0x197   : > { %4591 = vmatprep.mubr.msk.f32.mxu0 %vm948_vm2, %v6130_v44  ;;  %4812 = vmatprep.mubr.msk.f32.mxu1 %vm948_vm2, %v6152_v58 }
 0x19a   : > { %4592 = vmatmul.mubr.msk.f32.gmra.mrb[48].mxu0 %vm948_vm2, %v6143_v53  ;;  %4813 = vmatmul.mubr.msk.f32.gmra.mrb[14].mxu1 %vm948_vm2, %v6164_v63 }
 0x19b   : > { %4594 = vmatprep.mubr.msk.f32.mxu0 %vm948_vm2, %v6155_v42  ;;  %4815 = vmatprep.mubr.msk.f32.mxu1 %vm948_vm2, %v6170_v45 }
 0x19e   : > { %4595 = vmatmul.mubr.msk.f32.gmra.mrb[50].mxu0 %vm948_vm2, %v6167_v54  ;;  %4816 = vmatmul.mubr.msk.f32.gmra.mrb[16].mxu1 %vm948_vm2, %v6188_v5 }
 0x19f   : > { %4597 = vmatprep.mubr.msk.f32.mxu0 %vm948_vm2, %v6178_v8  ;;  %4818 = vmatprep.mubr.msk.f32.mxu1 %vm948_vm2, %v6200_v23 }
 0x1a2   : > { %4598 = vmatmul.mubr.msk.f32.gmra.mrb[52].mxu0 %vm948_vm2, %v6191_v29  ;;  %4819 = vmatmul.mubr.msk.f32.gmra.mrb[18].mxu1 %vm948_vm2, %v6212_v27 }
 0x1a3   : > { %4600 = vmatprep.mubr.msk.f32.mxu0 %vm948_vm2, %v6203_v26  ;;  %4821 = vmatprep.mubr.msk.f32.mxu1 %vm948_vm2, %v6218_v39 }
 0x1a6   : > { %4601 = vmatmul.mubr.msk.f32.gmra.mrb[54].mxu0 %vm948_vm2, %v6215_v19  ;;  %4822 = vmatmul.mubr.msk.f32.gmra.mrb[20].mxu1 %vm948_vm2, %v6236_v36 }
 0x1a7   : > { %4603 = vmatprep.mubr.msk.f32.mxu0 %vm948_vm2, %v7027_v49  ;;  %4824 = vmatprep.mubr.msk.f32.mxu1 %vm948_vm2, %v6248_v60 }
 0x1aa   : > { %4604 = vmatmul.mubr.msk.f32.gmra.mrb[56].mxu0 %vm948_vm2, %v7028_v25  ;;  %4825 = vmatmul.mubr.msk.f32.gmra.mrb[22].mxu1 %vm948_vm2, %v6260_v20 }
 0x1ab   : > { %4606 = vmatprep.mubr.msk.f32.mxu0 %vm948_vm2, %v6251_v43  ;;  %4827 = vmatprep.mubr.msk.f32.mxu1 %vm948_vm2, %v7029_v33 }
 0x1ae   : > { %4607 = vmatmul.mubr.msk.f32.gmra.mrb[58].mxu0 %vm948_vm2, %v7030_v34  ;;  %4828 = vmatmul.mubr.msk.f32.gmra.mrb[24].mxu1 %vm948_vm2, %v6284_v9 }
 0x1af   : > { %4609 = vmatprep.mubr.msk.f32.mxu0 %vm948_vm2, %v7031_v3  ;;  %4830 = vmatprep.mubr.msk.f32.mxu1 %vm948_vm2, %v6295_v37  ;;  %v7040_v3 = vld [vmem:[#allocation5_spill] sm:$0xff] }
 0x1b2   : > { %4610 = vmatmul.mubr.msk.f32.gmra.mrb[60].mxu0 %vm948_vm2, %v7032_v38  ;;  %4831 = vmatmul.mubr.msk.f32.gmra.mrb[26].mxu1 %vm948_vm2, %v6310_v55  ;;  %v7036_v38 = vld [vmem:[#allocation35_spill] sm:$0xff] }
 0x1b3   : > { %4612 = vmatprep.mubr.msk.f32.mxu0 %vm948_vm2, %v7033_v15  ;;  %4833 = vmatprep.mubr.msk.f32.mxu1 %vm948_vm2, %v6475_v35  ;;  %v3985_v15 = vld [vmem:[%s6923_s4 + $0x110] sm:$0xff] }
 0x1b6   : > { %4613 = vmatmul.mubr.msk.f32.gmra.mrb[62].mxu0 %vm948_vm2, %v7034_v32  ;;  %4834 = vmatmul.mubr.msk.f32.gmra.mrb[28].mxu1 %vm948_vm2, %v6482_v31  ;;  %v7038_v32 = vld [vmem:[#allocation32_spill] sm:$0xff] }
 0x1b7   : > { %4623 = vmatprep.mubr.msk.f32.mxu0 %vm948_vm2, %v7035_v56  ;;  %4836 = vmatprep.mubr.msk.f32.mxu1 %vm948_vm2, %v7036_v38  ;;  %v7039_v56 = vld [vmem:[#allocation6_spill] sm:$0xff]  ;;  %v5027_v38 = vpack.c.bf16 %v3986_v10, %v3985_v15  ;;  %v7047_v15 = vld [vmem:[#allocation15_spill] sm:$0xff] }
 0x1ba   : > { %4624 = vmatmul.mubr.msk.f32.vlgmr.msra.gmra.mrb[32].mxu0 %vm948_vm2, %v7037_v16  ;;  %4837 = vmatmul.mubr.msk.f32.gmra.mrb[30].mxu1 %vm948_vm2, %v7038_v32  ;;  %v7041_v16 = vld [vmem:[#allocation9_spill] sm:$0xff] }
 0x1bb   : > { %4626 = vmatprep.mubr.msk.f32.mxu0 %vm948_vm2, %v5976_v12  ;;  %4847 = vmatprep.mubr.msk.f32.mxu1 %vm948_vm2, %v7039_v56  ;;  %v7042_v12 = vld [vmem:[#allocation8_spill] sm:$0xff] }
 0x1be   : > { %4627 = vmatmul.mubr.msk.f32.gmra.mrb[34].mxu0 %vm948_vm2, %v5994_v41  ;;  %4848 = vmatmul.mubr.msk.f32.vlgmr.msra.gmra.mrb[0].mxu1 %vm948_vm2, %v7040_v3  ;;  %v7043_v41 = vld [vmem:[#allocation11_spill] sm:$0xff] }
 0x1bf   : > { %5026 = vmatpush3.bf16.msra.mxu1 %v6369_v14  ;;  %4629 = vmatprep.mubr.msk.f32.mxu0 %vm948_vm2, %v6006_v48  ;;  %v7044_v48 = vld [vmem:[#allocation10_spill] sm:$0xff] }
 0x1c0   : > { %4850 = vmatprep.mubr.msk.f32.mxu1 %vm948_vm2, %v7041_v16  ;;  %5028 = vmatprep.subr.bf16.mxu1 %v5027_v38 }
 0x1c2   : > { %4630 = vmatmul.mubr.msk.f32.gmra.mrb[36].mxu0 %vm948_vm2, %v6019_v61  ;;  %4851 = vmatmul.mubr.msk.f32.gmra.mrb[2].mxu1 %vm948_vm2, %v7042_v12  ;;  %v7045_v61 = vld [vmem:[#allocation13_spill] sm:$0xff] }
 0x1c3   : > { %4632 = vmatprep.mubr.msk.f32.mxu0 %vm948_vm2, %v6025_v2  ;;  %4853 = vmatprep.mubr.msk.f32.mxu1 %vm948_vm2, %v7043_v41  ;;  %v7046_v2 = vld [vmem:[#allocation12_spill] sm:$0xff] }
 0x1c4   : > { %5030 = vmatpush3.bf16.msra.mxu1 %v5027_v38 }
 0x1c6   : > { %4633 = vmatmul.mubr.msk.f32.gmra.mrb[38].mxu0 %vm948_vm2, %v6044_v17  ;;  %4854 = vmatmul.mubr.msk.f32.gmra.mrb[4].mxu1 %vm948_vm2, %v7044_v48  ;;  %v7048_v17 = vld [vmem:[#allocation14_spill] sm:$0xff] }
 0x1c7   : > { %4635 = vmatprep.mubr.msk.f32.mxu0 %vm948_vm2, %v6056_v21  ;;  %4856 = vmatprep.mubr.msk.f32.mxu1 %vm948_vm2, %v7045_v61  ;;  %v7049_v21 = vld [vmem:[#allocation17_spill] sm:$0xff] }
 0x1c8   : > { %v6741_v61 = vld [vmem:[%s6924_s5] ss:$0 sm:$0xff] }
 0x1ca   : > { %4636 = vmatmul.mubr.msk.f32.gmra.mrb[40].mxu0 %vm948_vm2, %v6068_v47  ;;  %4857 = vmatmul.mubr.msk.f32.gmra.mrb[6].mxu1 %vm948_vm2, %v7046_v2  ;;  %v7050_v47 = vld [vmem:[#allocation16_spill] sm:$0xff] }
 0x1cb   : > { %4638 = vmatprep.mubr.msk.f32.mxu0 %vm948_vm2, %v6074_v57  ;;  %4859 = vmatprep.mubr.msk.f32.mxu1 %vm948_vm2, %v7047_v15  ;;  %v7051_v57 = vld [vmem:[#allocation19_spill] sm:$0xff] }
 0x1ce   : > { %4639 = vmatmul.mubr.msk.f32.gmra.mrb[42].mxu0 %vm948_vm2, %v6092_v51  ;;  %4860 = vmatmul.mubr.msk.f32.gmra.mrb[8].mxu1 %vm948_vm2, %v7048_v17  ;;  %v7052_v51 = vld [vmem:[#allocation18_spill] sm:$0xff] }
 0x1cf   : > { %4641 = vmatprep.mubr.msk.f32.mxu0 %vm948_vm2, %v6104_v28  ;;  %4862 = vmatprep.mubr.msk.f32.mxu1 %vm948_vm2, %v7049_v21  ;;  %v7053_v28 = vld [vmem:[#allocation21_spill] sm:$0xff] }
 0x1d2   : > { %4642 = vmatmul.mubr.msk.f32.gmra.mrb[44].mxu0 %vm948_vm2, %v6116_v6  ;;  %4863 = vmatmul.mubr.msk.f32.gmra.mrb[10].mxu1 %vm948_vm2, %v7050_v47  ;;  %v7054_v6 = vld [vmem:[#allocation20_spill] sm:$0xff] }
 0x1d3   : > { %4644 = vmatprep.mubr.msk.f32.mxu0 %vm948_vm2, %v6122_v4  ;;  %4865 = vmatprep.mubr.msk.f32.mxu1 %vm948_vm2, %v7051_v57  ;;  %v7055_v4 = vld [vmem:[#allocation23_spill] sm:$0xff] }
 0x1d6   : > { %4645 = vmatmul.mubr.msk.f32.gmra.mrb[46].mxu0 %vm948_vm2, %v6140_v40  ;;  %4866 = vmatmul.mubr.msk.f32.gmra.mrb[12].mxu1 %vm948_vm2, %v7052_v51  ;;  %v7056_v40 = vld [vmem:[#allocation22_spill] sm:$0xff] }
 0x1d7   : > { %4647 = vmatprep.mubr.msk.f32.mxu0 %vm948_vm2, %v6152_v58  ;;  %4868 = vmatprep.mubr.msk.f32.mxu1 %vm948_vm2, %v7053_v28  ;;  %v7057_v58 = vld [vmem:[#allocation25_spill] sm:$0xff] }
 0x1da   : > { %4648 = vmatmul.mubr.msk.f32.gmra.mrb[48].mxu0 %vm948_vm2, %v6164_v63  ;;  %4869 = vmatmul.mubr.msk.f32.gmra.mrb[14].mxu1 %vm948_vm2, %v7054_v6  ;;  %v7058_v63 = vld [vmem:[#allocation24_spill] sm:$0xff] }
 0x1db   : > { %4650 = vmatprep.mubr.msk.f32.mxu0 %vm948_vm2, %v6170_v45  ;;  %4871 = vmatprep.mubr.msk.f32.mxu1 %vm948_vm2, %v7055_v4  ;;  %v7059_v45 = vld [vmem:[#allocation27_spill] sm:$0xff] }
 0x1de   : > { %4651 = vmatmul.mubr.msk.f32.gmra.mrb[50].mxu0 %vm948_vm2, %v6188_v5  ;;  %4872 = vmatmul.mubr.msk.f32.gmra.mrb[16].mxu1 %vm948_vm2, %v7056_v40  ;;  %v7060_v5 = vld [vmem:[#allocation26_spill] sm:$0xff] }
 0x1df   : > { %4653 = vmatprep.mubr.msk.f32.mxu0 %vm948_vm2, %v6200_v23  ;;  %4874 = vmatprep.mubr.msk.f32.mxu1 %vm948_vm2, %v7057_v58  ;;  %v7061_v23 = vld [vmem:[#allocation29_spill] sm:$0xff] }
 0x1e2   : > { %4654 = vmatmul.mubr.msk.f32.gmra.mrb[52].mxu0 %vm948_vm2, %v6212_v27  ;;  %4875 = vmatmul.mubr.msk.f32.gmra.mrb[18].mxu1 %vm948_vm2, %v7058_v63  ;;  %v7062_v27 = vld [vmem:[#allocation28_spill] sm:$0xff] }
 0x1e3   : > { %4656 = vmatprep.mubr.msk.f32.mxu0 %vm948_vm2, %v6218_v39  ;;  %4877 = vmatprep.mubr.msk.f32.mxu1 %vm948_vm2, %v7059_v45  ;;  %v7063_v39 = vld [vmem:[#allocation31_spill] sm:$0xff] }
 0x1e6   : > { %4657 = vmatmul.mubr.msk.f32.gmra.mrb[54].mxu0 %vm948_vm2, %v6236_v36  ;;  %4878 = vmatmul.mubr.msk.f32.gmra.mrb[20].mxu1 %vm948_vm2, %v7060_v5  ;;  %v7064_v36 = vld [vmem:[#allocation30_spill] sm:$0xff] }
 0x1e7   : > { %4659 = vmatprep.mubr.msk.f32.mxu0 %vm948_vm2, %v6248_v60  ;;  %4880 = vmatprep.mubr.msk.f32.mxu1 %vm948_vm2, %v7061_v23  ;;  %v7065_v60 = vld [vmem:[#allocation34_spill] sm:$0xff] }
 0x1ea   : > { %4660 = vmatmul.mubr.msk.f32.gmra.mrb[56].mxu0 %vm948_vm2, %v6260_v20  ;;  %4881 = vmatmul.mubr.msk.f32.gmra.mrb[22].mxu1 %vm948_vm2, %v7062_v27  ;;  %v7066_v20 = vld [vmem:[#allocation33_spill] sm:$0xff] }
 0x1eb   : > { %4662 = vmatprep.mubr.msk.f32.mxu0 %vm948_vm2, %v7029_v33  ;;  %4883 = vmatprep.mubr.msk.f32.mxu1 %vm948_vm2, %v7063_v39 }
 0x1ee   : > { %4663 = vmatmul.mubr.msk.f32.gmra.mrb[58].mxu0 %vm948_vm2, %v6284_v9  ;;  %4884 = vmatmul.mubr.msk.f32.gmra.mrb[24].mxu1 %vm948_vm2, %v7064_v36  ;;  %v7067_v9 = vmov 0.0  }
 0x1ef   : > { %4665 = vmatprep.mubr.msk.f32.mxu0 %vm948_vm2, %v6295_v37  ;;  %4886 = vmatprep.mubr.msk.f32.mxu1 %vm948_vm2, %v7065_v60 }
 0x1f2   : > { %4666 = vmatmul.mubr.msk.f32.gmra.mrb[60].mxu0 %vm948_vm2, %v6310_v55  ;;  %4887 = vmatmul.mubr.msk.f32.gmra.mrb[26].mxu1 %vm948_vm2, %v7066_v20 }
 0x1f3   : > { %4668 = vmatprep.mubr.msk.f32.mxu0 %vm948_vm2, %v6475_v35  ;;  %4889 = vmatprep.mubr.msk.f32.mxu1 %vm948_vm2, %v5924_v59 }
 0x1f6   : > { %4669 = vmatmul.mubr.msk.f32.gmra.mrb[62].mxu0 %vm948_vm2, %v6482_v31  ;;  %4890 = vmatmul.mubr.msk.f32.gmra.mrb[28].mxu1 %vm948_vm2, %v5912_v52 }
 0x1f7   : > { %4892 = vmatprep.mubr.f32.mxu1 %v7067_v9 }
 0x1fa   : > { %4893 = vmatmul.mubr.f32.gmra.mrb[30].mxu1 %v7067_v9 }
 0x1fb   : > { %4903 = vmatprep.mubr.msk.f32.mxu1 %vm948_vm2, %v5985_v30 }
 0x1fe   : > { %4904 = vmatmul.mubr.msk.f32.vlgmr.msra.gmra.mrb[0].mxu1 %vm948_vm2, %v5997_v46 }
 0x1ff   : > { %4906 = vmatprep.mubr.msk.f32.mxu1 %vm948_vm2, %v6009_v50 }
 0x202   : > { %4907 = vmatmul.mubr.msk.f32.gmra.mrb[2].mxu1 %vm948_vm2, %v6022_v62 }
 0x203   : > { %4909 = vmatprep.mubr.msk.f32.mxu1 %vm948_vm2, %v6034_v7 }
 0x206   : > { %4910 = vmatmul.mubr.msk.f32.gmra.mrb[4].mxu1 %vm948_vm2, %v6047_v18 }
 0x207   : > { %4912 = vmatprep.mubr.msk.f32.mxu1 %vm948_vm2, %v6059_v22 }
 0x20a   : > { %4913 = vmatmul.mubr.msk.f32.gmra.mrb[6].mxu1 %vm948_vm2, %v6071_v0 }
 0x20b   : > { %4915 = vmatprep.mubr.msk.f32.mxu1 %vm948_vm2, %v6082_v13 }
 0x20e   : > { %4916 = vmatmul.mubr.msk.f32.gmra.mrb[8].mxu1 %vm948_vm2, %v6095_v11  ;;  %v7072_v11 = vld [vmem:[#allocation46_spill] sm:$0xff] }
 0x20f   : > { %4918 = vmatprep.mubr.msk.f32.mxu1 %vm948_vm2, %v6107_v1  ;;  %v7071_v1 = vld [vmem:[#allocation45_spill] sm:$0xff] }
 0x212   : > { %4919 = vmatmul.mubr.msk.f32.gmra.mrb[10].mxu1 %vm948_vm2, %v6119_v24  ;;  %v7073_v24 = vld [vmem:[#allocation48_spill] sm:$0xff] }
 0x213   : > { %4921 = vmatprep.mubr.msk.f32.mxu1 %vm948_vm2, %v6130_v44  ;;  %v7074_v44 = vld [vmem:[#allocation44_spill] sm:$0xff] }
 0x216   : > { %4922 = vmatmul.mubr.msk.f32.gmra.mrb[12].mxu1 %vm948_vm2, %v6143_v53  ;;  %v7070_v53 = vld [vmem:[#allocation43_spill] sm:$0xff] }
 0x217   : > { %4924 = vmatprep.mubr.msk.f32.mxu1 %vm948_vm2, %v6155_v42  ;;  %v7068_v42 = vld [vmem:[#allocation41_spill] sm:$0xff] }
 0x21a   : > { %4925 = vmatmul.mubr.msk.f32.gmra.mrb[14].mxu1 %vm948_vm2, %v6167_v54  ;;  %v7075_v54 = vld [vmem:[#allocation47_spill] sm:$0xff] }
 0x21b   : > { %4927 = vmatprep.mubr.msk.f32.mxu1 %vm948_vm2, %v6178_v8 }
 0x21e   : > { %4928 = vmatmul.mubr.msk.f32.gmra.mrb[16].mxu1 %vm948_vm2, %v6191_v29  ;;  %v7069_v29 = vld [vmem:[#allocation42_spill] sm:$0xff] }
 0x21f   : > { %4930 = vmatprep.mubr.msk.f32.mxu1 %vm948_vm2, %v6203_v26 }
 0x222   : > { %4931 = vmatmul.mubr.msk.f32.gmra.mrb[18].mxu1 %vm948_vm2, %v6215_v19 }
 0x223   : > { %4933 = vmatprep.mubr.msk.f32.mxu1 %vm948_vm2, %v7027_v49 }
 0x226   : > { %4934 = vmatmul.mubr.msk.f32.gmra.mrb[20].mxu1 %vm948_vm2, %v7028_v25 }
 0x227   : > { %4936 = vmatprep.mubr.msk.f32.mxu1 %vm948_vm2, %v6251_v43 }
 0x22a   : > { %4937 = vmatmul.mubr.msk.f32.gmra.mrb[22].mxu1 %vm948_vm2, %v7030_v34 }
 0x22b   : > { %4939 = vmatprep.mubr.msk.f32.mxu1 %vm948_vm2, %v7068_v42 }
 0x22e   : > { %4940 = vmatmul.mubr.msk.f32.gmra.mrb[24].mxu1 %vm948_vm2, %v7069_v29 }
 0x22f   : > { %4942 = vmatprep.mubr.msk.f32.mxu1 %vm948_vm2, %v7070_v53 }
 0x232   : > { %4943 = vmatmul.mubr.msk.f32.gmra.mrb[26].mxu1 %vm948_vm2, %v7071_v1 }
 0x233   : > { %4945 = vmatprep.mubr.msk.f32.mxu1 %vm948_vm2, %v7072_v11 }
 0x236   : > { %4946 = vmatmul.mubr.msk.f32.gmra.mrb[28].mxu1 %vm948_vm2, %v7073_v24 }
 0x237   : > { %4948 = vmatprep.mubr.msk.f32.mxu1 %vm948_vm2, %v7074_v44 }
 0x23a   : > { %4949 = vmatmul.mubr.msk.f32.gmra.mrb[30].mxu1 %vm948_vm2, %v7075_v54 }
 0x28d   : > { %v4625_v8 = vpop.f32.mrb[32].mxu0 }
 0x28e   : > { %v1959_v19 = vpop.f32.mrb[33].mxu0 }
 0x291   : > { %v4628_v43 = vpop.f32.mrb[34].mxu0 }
 0x292   : > { %v1969_v55 = vpop.f32.mrb[35].mxu0 }
 0x295   : > { %v4631_v26 = vpop.f32.mrb[36].mxu0 }
 0x296   : > { %v1979_v31 = vpop.f32.mrb[37].mxu0 }
 0x299   : > { %v4634_v37 = vpop.f32.mrb[38].mxu0 }
 0x29a   : > { %v1989_v52 = vpop.f32.mrb[39].mxu0 }
 0x29d   : > { %v6689_v59 = vpop.f32.mrb[40].mxu0 }
 0x29e   : > { %v6691_v30 = vpop.f32.mrb[41].mxu0 }
 0x2a1   : > { %v6693_v46 = vpop.f32.mrb[42].mxu0 }
 0x2a2   : > { %v6695_v50 = vpop.f32.mrb[43].mxu0 }
 0x2a5   : > { %v6697_v62 = vpop.f32.mrb[44].mxu0 }
 0x2a6   : > { %v6699_v7 = vpop.f32.mrb[45].mxu0 }
 0x2a9   : > { %v6701_v18 = vpop.f32.mrb[46].mxu0 }
 0x2aa   : > { %v6703_v22 = vpop.f32.mrb[47].mxu0 }
 0x2ad   : > { %v6705_v0 = vpop.f32.mrb[48].mxu0 }
 0x2ae   : > { %v6707_v13 = vpop.f32.mrb[49].mxu0 }
 0x2b1   : > { %v6709_v32 = vpop.f32.mrb[50].mxu0 }
 0x2b2   : > { %v6711_v14 = vpop.f32.mrb[51].mxu0 }
 0x2b5   : > { %v6713_v49 = vpop.f32.mrb[52].mxu0 }
 0x2b6   : > { %v6715_v25 = vpop.f32.mrb[53].mxu0 }
 0x2b9   : > { %v6717_v33 = vpop.f32.mrb[54].mxu0 }
 0x2ba   : > { %v6719_v34 = vpop.f32.mrb[55].mxu0 }
 0x2bd   : > { %v6721_v3 = vpop.f32.mrb[56].mxu0 }
 0x2be   : > { %v6723_v35 = vpop.f32.mrb[57].mxu0 }
 0x2c1   : > { %v6725_v10 = vpop.f32.mrb[58].mxu0 }
 0x2c2   : > { %v6727_v56 = vpop.f32.mrb[59].mxu0 }
 0x2c5   : > { %v6729_v38 = vpop.f32.mrb[60].mxu0 }
 0x2c6   : > { %v6731_v16 = vpop.f32.mrb[61].mxu0 }
 0x2c9   : > { %v6733_v12 = vpop.f32.mrb[62].mxu0 }
 0x2ca   : > { %v6735_v41 = vpop.f32.mrb[63].mxu0 }
 0x2d1   : > { %v4905_v48 = vpop.f32.mrb[0].mxu1 }
 0x2d2   : > { %v5031_v2 = vadd.f32 %v4905_v48, %v4625_v8  ;;  %v3278_v15 = vpop.f32.mrb[1].mxu1 }
 0x2d3   : > { %v5032_v17 = vadd.f32 %v3278_v15, %v1959_v19 }
 0x2d4   : > { %v3477_v21 = vadd.f32 %v5031_v2, %v6741_v61 }
 0x2d5   : > { %v3476_v47 = vadd.f32 %v5032_v17, %v6741_v61  ;;  %v4908_v57 = vpop.f32.mrb[2].mxu1 }
 0x2d6   : > { %v3509_v51 = vmax.f32 %v3477_v21, 0.0  ;;  %v5033_v28 = vadd.f32 %v4908_v57, %v4628_v43  ;;  %v3288_v6 = vpop.f32.mrb[3].mxu1 }
 0x2d7   : > { %v3508_v4 = vmax.f32 %v3476_v47, 0.0  ;;  %v5034_v40 = vadd.f32 %v3288_v6, %v1969_v55 }
 0x2d8   : > { %3541 = vst.msk [vmem:[%s6747_s26 + $0x8] sm:$0xff] %vm948_vm2, %v3509_v51  ;;  %v3479_v58 = vadd.f32 %v5033_v28, %v6741_v61 }
 0x2d9   : > { %3540 = vst.msk [vmem:[%s6747_s26] sm:$0xff] %vm948_vm2, %v3508_v4  ;;  %v3478_v63 = vadd.f32 %v5034_v40, %v6741_v61  ;;  %v4911_v45 = vpop.f32.mrb[4].mxu1 }
 0x2da   : > { %v3511_v5 = vmax.f32 %v3479_v58, 0.0  ;;  %v5035_v23 = vadd.f32 %v4911_v45, %v4631_v26  ;;  %v3298_v27 = vpop.f32.mrb[5].mxu1 }
 0x2db   : > { %v3510_v39 = vmax.f32 %v3478_v63, 0.0  ;;  %v5036_v36 = vadd.f32 %v3298_v27, %v1979_v31 }
 0x2dc   : > { %3543 = vst.msk [vmem:[%s6747_s26 + $0x18] sm:$0xff] %vm948_vm2, %v3511_v5  ;;  %v3481_v60 = vadd.f32 %v5035_v23, %v6741_v61 }
 0x2dd   : > { %3542 = vst.msk [vmem:[%s6747_s26 + $0x10] sm:$0xff] %vm948_vm2, %v3510_v39  ;;  %v3480_v20 = vadd.f32 %v5036_v36, %v6741_v61  ;;  %v4914_v9 = vpop.f32.mrb[6].mxu1 }
 0x2de   : > { %v3513_v42 = vmax.f32 %v3481_v60, 0.0  ;;  %v5037_v29 = vadd.f32 %v4914_v9, %v4634_v37  ;;  %v3308_v53 = vpop.f32.mrb[7].mxu1 }
 0x2df   : > { %v3512_v1 = vmax.f32 %v3480_v20, 0.0  ;;  %v5038_v11 = vadd.f32 %v3308_v53, %v1989_v52 }
 0x2e0   : > { %3545 = vst.msk [vmem:[%s6747_s26 + $0x28] sm:$0xff] %vm948_vm2, %v3513_v42  ;;  %v3483_v24 = vadd.f32 %v5037_v29, %v6741_v61 }
 0x2e1   : > { %3544 = vst.msk [vmem:[%s6747_s26 + $0x20] sm:$0xff] %vm948_vm2, %v3512_v1  ;;  %v3482_v44 = vadd.f32 %v5038_v11, %v6741_v61  ;;  %v4917_v54 = vpop.f32.mrb[8].mxu1 }
 0x2e2   : > { %v3515_v8 = vmax.f32 %v3483_v24, 0.0  ;;  %v5039_v19 = vadd.f32 %v4917_v54, %v6689_v59  ;;  %v3318_v43 = vpop.f32.mrb[9].mxu1 }
 0x2e3   : > { %v3514_v55 = vmax.f32 %v3482_v44, 0.0  ;;  %v5040_v26 = vadd.f32 %v3318_v43, %v6691_v30 }
 0x2e4   : > { %3547 = vst.msk [vmem:[%s6747_s26 + $0x38] sm:$0xff] %vm948_vm2, %v3515_v8  ;;  %v3485_v31 = vadd.f32 %v5039_v19, %v6741_v61 }
 0x2e5   : > { %3546 = vst.msk [vmem:[%s6747_s26 + $0x30] sm:$0xff] %vm948_vm2, %v3514_v55  ;;  %v3484_v37 = vadd.f32 %v5040_v26, %v6741_v61  ;;  %v4920_v52 = vpop.f32.mrb[10].mxu1 }
 0x2e6   : > { %v3517_v48 = vmax.f32 %v3485_v31, 0.0  ;;  %v5041_v2 = vadd.f32 %v4920_v52, %v6693_v46  ;;  %v3328_v59 = vpop.f32.mrb[11].mxu1 }
 0x2e7   : > { %v3516_v15 = vmax.f32 %v3484_v37, 0.0  ;;  %v5042_v17 = vadd.f32 %v3328_v59, %v6695_v50 }
 0x2e8   : > { %3549 = vst.msk [vmem:[%s6747_s26 + $0x48] sm:$0xff] %vm948_vm2, %v3517_v48  ;;  %v3487_v30 = vadd.f32 %v5041_v2, %v6741_v61 }
 0x2e9   : > { %3548 = vst.msk [vmem:[%s6747_s26 + $0x40] sm:$0xff] %vm948_vm2, %v3516_v15  ;;  %v3486_v21 = vadd.f32 %v5042_v17, %v6741_v61  ;;  %v4923_v47 = vpop.f32.mrb[12].mxu1 }
 0x2ea   : > { %v3519_v57 = vmax.f32 %v3487_v30, 0.0  ;;  %v5043_v51 = vadd.f32 %v4923_v47, %v6697_v62  ;;  %v3338_v46 = vpop.f32.mrb[13].mxu1 }
 0x2eb   : > { %v3518_v28 = vmax.f32 %v3486_v21, 0.0  ;;  %v5044_v6 = vadd.f32 %v3338_v46, %v6699_v7 }
 0x2ec   : > { %3551 = vst.msk [vmem:[%s6747_s26 + $0x58] sm:$0xff] %vm948_vm2, %v3519_v57  ;;  %v3489_v50 = vadd.f32 %v5043_v51, %v6741_v61 }
 0x2ed   : > { %3550 = vst.msk [vmem:[%s6747_s26 + $0x50] sm:$0xff] %vm948_vm2, %v3518_v28  ;;  %v3488_v4 = vadd.f32 %v5044_v6, %v6741_v61  ;;  %v4926_v40 = vpop.f32.mrb[14].mxu1 }
 0x2ee   : > { %v3521_v58 = vmax.f32 %v3489_v50, 0.0  ;;  %v5045_v63 = vadd.f32 %v4926_v40, %v6701_v18  ;;  %v3348_v62 = vpop.f32.mrb[15].mxu1 }
 0x2ef   : > { %v3520_v45 = vmax.f32 %v3488_v4, 0.0  ;;  %v5046_v5 = vadd.f32 %v3348_v62, %v6703_v22 }
 0x2f0   : > { %3553 = vst.msk [vmem:[%s6747_s26 + $0x68] sm:$0xff] %vm948_vm2, %v3521_v58  ;;  %v3491_v7 = vadd.f32 %v5045_v63, %v6741_v61 }
 0x2f1   : > { %3552 = vst.msk [vmem:[%s6747_s26 + $0x60] sm:$0xff] %vm948_vm2, %v3520_v45  ;;  %v3490_v23 = vadd.f32 %v5046_v5, %v6741_v61  ;;  %v4929_v27 = vpop.f32.mrb[16].mxu1 }
 0x2f2   : > { %v3523_v39 = vmax.f32 %v3491_v7, 0.0  ;;  %v5047_v36 = vadd.f32 %v4929_v27, %v6705_v0  ;;  %v3358_v18 = vpop.f32.mrb[17].mxu1 }
 0x2f3   : > { %v3522_v60 = vmax.f32 %v3490_v23, 0.0  ;;  %v5048_v20 = vadd.f32 %v3358_v18, %v6707_v13 }
 0x2f4   : > { %3555 = vst.msk [vmem:[%s6747_s26 + $0x78] sm:$0xff] %vm948_vm2, %v3523_v39  ;;  %v3493_v22 = vadd.f32 %v5047_v36, %v6741_v61 }
 0x2f5   : > { %3554 = vst.msk [vmem:[%s6747_s26 + $0x70] sm:$0xff] %vm948_vm2, %v3522_v60  ;;  %v3492_v9 = vadd.f32 %v5048_v20, %v6741_v61  ;;  %v4932_v42 = vpop.f32.mrb[18].mxu1 }
 0x2f6   : > { %v3525_v29 = vmax.f32 %v3493_v22, 0.0  ;;  %v5049_v53 = vadd.f32 %v4932_v42, %v6709_v32  ;;  %v3368_v0 = vpop.f32.mrb[19].mxu1 }
 0x2f7   : > { %v3524_v1 = vmax.f32 %v3492_v9, 0.0  ;;  %v5050_v11 = vadd.f32 %v3368_v0, %v6711_v14 }
 0x2f8   : > { %3557 = vst.msk [vmem:[%s6747_s26 + $0x88] sm:$0xff] %vm948_vm2, %v3525_v29  ;;  %v3495_v13 = vadd.f32 %v5049_v53, %v6741_v61 }
 0x2f9   : > { %3556 = vst.msk [vmem:[%s6747_s26 + $0x80] sm:$0xff] %vm948_vm2, %v3524_v1  ;;  %v3494_v24 = vadd.f32 %v5050_v11, %v6741_v61  ;;  %v4935_v44 = vpop.f32.mrb[20].mxu1 }
 0x2fa   : > { %v3527_v54 = vmax.f32 %v3495_v13, 0.0  ;;  %v5051_v8 = vadd.f32 %v4935_v44, %v6713_v49  ;;  %v3378_v32 = vpop.f32.mrb[21].mxu1 }
 0x2fb   : > { %v3526_v19 = vmax.f32 %v3494_v24, 0.0  ;;  %v5052_v43 = vadd.f32 %v3378_v32, %v6715_v25 }
 0x2fc   : > { %3559 = vst.msk [vmem:[%s6747_s26 + $0x98] sm:$0xff] %vm948_vm2, %v3527_v54  ;;  %v3497_v14 = vadd.f32 %v5051_v8, %v6741_v61 }
 0x2fd   : > { %3558 = vst.msk [vmem:[%s6747_s26 + $0x90] sm:$0xff] %vm948_vm2, %v3526_v19  ;;  %v3496_v55 = vadd.f32 %v5052_v43, %v6741_v61  ;;  %v4938_v26 = vpop.f32.mrb[22].mxu1 }
 0x2fe   : > { %v3529_v31 = vmax.f32 %v3497_v14, 0.0  ;;  %v5053_v37 = vadd.f32 %v4938_v26, %v6717_v33  ;;  %v3388_v49 = vpop.f32.mrb[23].mxu1 }
 0x2ff   : > { %v3528_v52 = vmax.f32 %v3496_v55, 0.0  ;;  %v5054_v48 = vadd.f32 %v3388_v49, %v6719_v34 }
 0x300   : > { %3561 = vst.msk [vmem:[%s6747_s26 + $0xa8] sm:$0xff] %vm948_vm2, %v3529_v31  ;;  %v3499_v25 = vadd.f32 %v5053_v37, %v6741_v61 }
 0x301   : > { %3560 = vst.msk [vmem:[%s6747_s26 + $0xa0] sm:$0xff] %vm948_vm2, %v3528_v52  ;;  %v3498_v2 = vadd.f32 %v5054_v48, %v6741_v61  ;;  %v4941_v59 = vpop.f32.mrb[24].mxu1 }
 0x302   : > { %v3531_v15 = vmax.f32 %v3499_v25, 0.0  ;;  %v5055_v17 = vadd.f32 %v4941_v59, %v6721_v3  ;;  %v3398_v33 = vpop.f32.mrb[25].mxu1 }
 0x303   : > { %v3530_v30 = vmax.f32 %v3498_v2, 0.0  ;;  %v5056_v21 = vadd.f32 %v3398_v33, %v6723_v35 }
 0x304   : > { %3563 = vst.msk [vmem:[%s6747_s26 + $0xb8] sm:$0xff] %vm948_vm2, %v3531_v15  ;;  %v3501_v34 = vadd.f32 %v5055_v17, %v6741_v61 }
 0x305   : > { %3562 = vst.msk [vmem:[%s6747_s26 + $0xb0] sm:$0xff] %vm948_vm2, %v3530_v30  ;;  %v3500_v47 = vadd.f32 %v5056_v21, %v6741_v61  ;;  %v4944_v57 = vpop.f32.mrb[26].mxu1 }
 0x306   : > { %v3533_v51 = vmax.f32 %v3501_v34, 0.0  ;;  %v5057_v46 = vadd.f32 %v4944_v57, %v6725_v10  ;;  %v3408_v3 = vpop.f32.mrb[27].mxu1 }
 0x307   : > { %v3532_v28 = vmax.f32 %v3500_v47, 0.0  ;;  %v5058_v6 = vadd.f32 %v3408_v3, %v6727_v56 }
 0x308   : > { %3565 = vst.msk [vmem:[%s6747_s26 + $0xc8] sm:$0xff] %vm948_vm2, %v3533_v51  ;;  %v3503_v35 = vadd.f32 %v5057_v46, %v6741_v61 }
 0x309   : > { %3564 = vst.msk [vmem:[%s6747_s26 + $0xc0] sm:$0xff] %vm948_vm2, %v3532_v28  ;;  %v3502_v50 = vadd.f32 %v5058_v6, %v6741_v61  ;;  %v4947_v4 = vpop.f32.mrb[28].mxu1 }
 0x30a   : > { %v3535_v40 = vmax.f32 %v3503_v35, 0.0  ;;  %v5059_v58 = vadd.f32 %v4947_v4, %v6729_v38  ;;  %v3418_v10 = vpop.f32.mrb[29].mxu1 }
 0x30b   : > { %v3534_v63 = vmax.f32 %v3502_v50, 0.0  ;;  %v5060_v56 = vadd.f32 %v3418_v10, %v6731_v16 }
 0x30c   : > { %3567 = vst.msk [vmem:[%s6747_s26 + $0xd8] sm:$0xff] %vm948_vm2, %v3535_v40  ;;  %v3505_v62 = vadd.f32 %v5059_v58, %v6741_v61 }
 0x30d   : > { %3566 = vst.msk [vmem:[%s6747_s26 + $0xd0] sm:$0xff] %vm948_vm2, %v3534_v63  ;;  %v3504_v45 = vadd.f32 %v5060_v56, %v6741_v61  ;;  %v4950_v5 = vpop.f32.mrb[30].mxu1 }
 0x30e   : > { %v3537_v7 = vmax.f32 %v3505_v62, 0.0  ;;  %v5061_v38 = vadd.f32 %v4950_v5, %v6733_v12  ;;  %v3428_v23 = vpop.f32.mrb[31].mxu1 }
 0x30f   : > { %v3536_v27 = vmax.f32 %v3504_v45, 0.0  ;;  %v5062_v39 = vadd.f32 %v3428_v23, %v6735_v41 }
 0x310   : > { %3569 = vst.msk [vmem:[%s6747_s26 + $0xe8] sm:$0xff] %vm948_vm2, %v3537_v7  ;;  %v3507_v16 = vadd.f32 %v5061_v38, %v6741_v61 }
 0x311   : > { %3568 = vst.msk [vmem:[%s6747_s26 + $0xe0] sm:$0xff] %vm948_vm2, %v3536_v27  ;;  %v3506_v36 = vadd.f32 %v5062_v39, %v6741_v61 }
 0x312   : > { %v3539_v18 = vmax.f32 %v3507_v16, 0.0 }
 0x313   : > { %v3538_v12 = vmax.f32 %v3506_v36, 0.0 }
 0x314   : > { %3571 = vst.msk [vmem:[%s6747_s26 + $0xf8] sm:$0xff] %vm948_vm2, %v3539_v18 }
 0x315   : > { %3570 = vst.msk [vmem:[%s6747_s26 + $0xf0] sm:$0xff] %vm948_vm2, %v3538_v12 }
 0x316   : > { %5342 = shalt.err (!%p5339_p3)
}
 0x317   : > { %s5343_s14 = scalar_lea.hbm %s6868_s9, 4096  ;;  %s5347_s19 = scalar_lea.hbm %s6925_s6, 8192 }
 0x318   : > { %p5344_p4 = scmp.ne.s32.totalorder %s6868_s9, %s5343_s14  ;;  %p5348_p9 = scmp.lt.u32.totalorder %s6868_s9, %s6925_s6 }
 0x319   : > { %p5349_p10 = scmp.lt.u32.totalorder %s5347_s19, %s5343_s14  ;;  %p5351_p12 = scmp.lt.u32.totalorder %s5343_s14, %s6868_s9 }
 0x31a   : > { %p5345_p7 = pnand %p5344_p4, %p5470_p5 }
 0x31b   : > { %p5350_p11 = por %p5349_p10, %p5348_p9 }
 0x31c   : > { %p5346_p8 = pneg %p5345_p7 }
 0x31d   : > { %p5352_p13 = por %p5351_p12, %p5350_p11 }
 0x31f   : > { %p5353_p0 = pnand %p5352_p13, %p5346_p8 }
 0x321   : > { %5356 = shalt.err (!%p5353_p0)
}
 0x322   : > { %s5395_s17 = smov 128   ;;  %s5396_s18 = smov 8  }
 0x323   : > { %5287 = dma.vmem_to_hbm [thread:$0]  (%p5470_p5), %s6870_s28, 4096, %s6868_s9, %s6878_s25, %s5395_s17, %s5395_s17, %s5396_s18  }
 0x324 PF: > { %p5293_p1 = scmp.ge.s32.totalorder %s5391_s24, 2  ;;  %s3601_s29 = sand.u32 1, %s5379_s21  }
 0x325   : > { %s3602_s10 = scalar_lea.sflag [#allocation3], %s3601_s29 }
 0x326   : > { %p5290_p2 = pnand %p5293_p1, %p5474_p6 }
 0x328   : > { %5374 = dma.done.wait (!%p5290_p2), %s3602_s10, 4096  }
 0x329   : > { %5376 = vsyncadd (!%p5290_p2), %s3602_s10, 4294963200  ;;  %p16_p3 = scmp.ge.s32.totalorder %s5457_s27, 4   ;;  %s7076_s21 = smov %s5383_s22 }
 0x32a   : > { %s7077_s22 = smov %s5387_s23  ;;  %s7078_s23 = smov %s5468_s30 }
 0x32b   : > { %s7079_s24 = smov %s5457_s27  ;;  %18 = sbr.rel (!%p16_p3) target bundleno = 3 (0x3), region = 90 }
 0x332   :  { %3607 = vsyncpa [#allocation3], 1 }
 0x333   :  { %3609 = vsyncpa [#allocation3 + $0x1], 1 }

</bundles_post_ra>
